<compile_context>
chip_gen: v6e
topology: v6e:2x2x1
jax: 0.10.0
libtpu: 0.0.40
codegen_flags: <defaults>
</compile_context>

<pallas_src>
import jax
import jax.numpy as jnp
from jax.experimental import pallas as pl
from jax.experimental.pallas import tpu as pltpu


def _round_up(x, m):
    return ((x + m - 1) // m) * m


# --------------------------------------------------------------------------
# One-time (import-time) feature / hardware probes
# --------------------------------------------------------------------------

def _probe_buffered_blockspec():
    """Does this Pallas build accept BlockSpec(pipeline_mode=pl.Buffered(n))?"""
    if not hasattr(pl, "Buffered"):
        return False
    try:
        pl.BlockSpec((8, 128), lambda i: (0, 0), pipeline_mode=pl.Buffered(1))
        return True
    except (TypeError, ValueError):
        return False


_HAS_BUFFERED = _probe_buffered_blockspec()


def _vmem_budget_bytes():
    """Generation-aware VMEM budget: 75% of physical VMEM, capped at 100 MiB.

    ~48 MiB on v7x (64 MiB physical), ~96 MiB on v5e/v6e (128 MiB physical).
    """
    try:
        cap = getattr(pltpu.get_tpu_info(), "vmem_capacity_bytes", None)
        if cap:
            return min(int(cap) * 3 // 4, 100 * 1024 * 1024)
    except Exception:
        # Probe only -- fall back to the strictest (v7x) budget.
        pass
    return 48 * 1024 * 1024


_VMEM_BUDGET = _vmem_budget_bytes()


# --------------------------------------------------------------------------
# Kernels
# --------------------------------------------------------------------------

def _mlp_kernel(x_ref, w_ref, b_ref, o_ref):
    # x_ref: (TB, H) f32/bf16   w_ref: (H, TN) bf16   b_ref: (1, TN) f32
    # o_ref: (TB, TN) f32/bf16
    x = x_ref[...].astype(w_ref.dtype)                               # MXU operands in bf16
    y = jnp.dot(x, w_ref[...], preferred_element_type=jnp.float32)   # f32 accumulation
    y = y + b_ref[...].astype(jnp.float32)                           # f32 bias (VALU)
    # f32 tanh on the EUP -- free filler while the kernel is HBM-bound.
    o_ref[...] = jnp.tanh(y).astype(o_ref.dtype)


def _mlp_kernel_ktiled(x_ref, w_ref, b_ref, o_ref, acc_ref):
    # grid = (col, row, k), k innermost ("arbitrary"); acc_ref: (TB, TN) f32.
    k = pl.program_id(2)

    @pl.when(k == 0)
    def _():
        acc_ref[...] = jnp.zeros_like(acc_ref)

    x = x_ref[...].astype(w_ref.dtype)
    acc_ref[...] += jnp.dot(x, w_ref[...], preferred_element_type=jnp.float32)

    @pl.when(k == pl.num_programs(2) - 1)
    def _():
        y = acc_ref[...] + b_ref[...].astype(jnp.float32)
        o_ref[...] = jnp.tanh(y).astype(o_ref.dtype)


# --------------------------------------------------------------------------
# Tile selection
# --------------------------------------------------------------------------

_ROW_ALIGN = 16  # multiple of 8 (f32 sublane) and 16 (bf16 sublane packing)


def _pick_batch_tile(n_rows):
    # Tiny heads (the real CoCondenser CLS head is ~2*B rows): single step.
    if n_rows <= 128:
        return _round_up(n_rows, _ROW_ALIGN)
    # Medium batches: split into (at least) 2 tiles so both v7x TensorCores
    # get a batch slice through the "parallel" grid axis.
    target = 1024 if n_rows >= 4096 else 512
    if n_rows <= 2 * target:
        return _round_up(-(-n_rows // 2), _ROW_ALIGN)
    return target


def _vmem_usage(tb, tn, tk, x_itemsize, out_itemsize, single_buffer_w, ktiled):
    use = 2 * tb * tk * x_itemsize                       # x block, double-buffered
    use += (1 if single_buffer_w else 2) * tk * tn * 2   # bf16 weight tile
    use += 2 * 8 * tn * 4                                # bias (sublane-padded)
    use += 2 * tb * tn * out_itemsize                    # output block
    if ktiled:
        use += tb * tn * 4                               # f32 accumulator scratch
    return use


def _select_tiles(n_rows, hidden, x_itemsize, out_itemsize, budget,
                  tb_req=None, tk_req=None):
    if tb_req is not None:
        tb = _round_up(max(int(tb_req), _ROW_ALIGN), _ROW_ALIGN)
    else:
        tb = _pick_batch_tile(n_rows)
    tb = max(_ROW_ALIGN, min(tb, _round_up(n_rows, _ROW_ALIGN)))

    col_cands = [hidden] + [t for t in (1024, 768, 512, 384, 256, 128)
                            if t < hidden and hidden % t == 0]
    if tk_req is not None:
        k_cands = [int(tk_req)]
    else:
        k_cands = [hidden] + [t for t in (2048, 1024, 512, 256, 128)
                              if t < hidden and hidden % t == 0]

    while True:
        for tk in k_cands:                 # prefer un-tiled K (no accumulator)
            for tn in col_cands:           # prefer whole weight resident
                ktiled = tk < hidden
                single_w = _HAS_BUFFERED and (not ktiled) and (tn == hidden)
                if _vmem_usage(tb, tn, tk, x_itemsize, out_itemsize,
                               single_w, ktiled) <= budget:
                    return tb, tn, tk, single_w, ktiled
        if tb <= _ROW_ALIGN:
            tn, tk = col_cands[-1], k_cands[-1]
            return tb, tn, tk, False, tk < hidden
        tb = max(_ROW_ALIGN, _round_up(tb // 2, _ROW_ALIGN))


# --------------------------------------------------------------------------
# pallas_call builder
# --------------------------------------------------------------------------

def _build_call(n_rows, hidden, tb, tn, tk, x_dtype, out_dtype,
                single_buffer_w, ktiled, vmem_limit):
    ncol = hidden // tn
    nrow = n_rows // tb
    x_itemsize = jnp.dtype(x_dtype).itemsize
    out_itemsize = jnp.dtype(out_dtype).itemsize

    if not ktiled:
        # Column tiles OUTER, batch tiles INNER: the weight column tile stays
        # resident across all batch steps (fetched once per column step).
        grid = (ncol, nrow)
        w_kwargs = {}
        if single_buffer_w:
            # Grid-invariant weight -> one VMEM copy is enough.
            w_kwargs["pipeline_mode"] = pl.Buffered(1)
        in_specs = [
            pl.BlockSpec((tb, hidden), lambda j, i: (i, 0)),
            pl.BlockSpec((hidden, tn), lambda j, i: (0, j), **w_kwargs),
            pl.BlockSpec((1, tn), lambda j, i: (0, j)),
        ]
        out_specs = pl.BlockSpec((tb, tn), lambda j, i: (i, j))
        scratch_shapes = []
        kernel = _mlp_kernel
        semantics = ("parallel", "parallel")
        w_bytes = hidden * hidden * 2
        x_bytes = ncol * n_rows * hidden * x_itemsize
    else:
        nk = hidden // tk
        grid = (ncol, nrow, nk)
        in_specs = [
            pl.BlockSpec((tb, tk), lambda j, i, k: (i, k)),
            pl.BlockSpec((tk, tn), lambda j, i, k: (k, j)),
            pl.BlockSpec((1, tn), lambda j, i, k: (0, j)),
        ]
        out_specs = pl.BlockSpec((tb, tn), lambda j, i, k: (i, j))
        scratch_shapes = [pltpu.VMEM((tb, tn), jnp.float32)]
        kernel = _mlp_kernel_ktiled
        semantics = ("parallel", "parallel", "arbitrary")
        # K-tiled path re-streams the weight once per batch tile.
        w_bytes = nrow * hidden * hidden * 2
        x_bytes = ncol * n_rows * hidden * x_itemsize

    cost = pl.CostEstimate(
        flops=2 * n_rows * hidden * hidden,
        transcendentals=n_rows * hidden,
        bytes_accessed=(x_bytes + w_bytes + hidden * 4
                        + n_rows * hidden * out_itemsize),
    )

    return pl.pallas_call(
        kernel,
        out_shape=jax.ShapeDtypeStruct((n_rows, hidden), out_dtype),
        grid_spec=pltpu.PrefetchScalarGridSpec(
            num_scalar_prefetch=0,
            grid=grid,
            in_specs=in_specs,
            out_specs=out_specs,
            scratch_shapes=scratch_shapes,
        ),
        compiler_params=pltpu.CompilerParams(
            dimension_semantics=semantics,
            vmem_limit_bytes=vmem_limit,
        ),
        cost_estimate=cost,
    )


# --------------------------------------------------------------------------
# Public API
# --------------------------------------------------------------------------

def prepare_mlp_params(weight, bias, compute_dtype=jnp.bfloat16):
    """One-time init: PyTorch [out, in] weight -> [in, out], cast to MXU dtype.

    Done once per model, NOT per forward call.  NOTE (intentional precision
    trade-off): the weight (and the activations, inside the kernel) run the
    MXU in bf16 while accumulation / bias / tanh stay in f32; this is not
    bit-identical to the all-f32 PyTorch reference (~1e-2 relative).
    """
    hidden = weight.shape[0]
    assert weight.shape == (hidden, hidden) and bias.shape == (hidden,)
    w_t = jnp.asarray(weight).T.astype(compute_dtype)           # [in, out]
    b2 = jnp.asarray(bias, dtype=jnp.float32).reshape(1, hidden)
    return w_t, b2


def mlp_layer(features, w_t, b2, *, out_dtype=None, tile_batch=None, tile_k=None):
    """tanh(features @ w_t + b2) -- the CoCondenser MLPLayer head.

    features: [..., H] in f32 OR bf16 (bf16 straight from a bf16 BERT backbone
    halves the activation HBM traffic; it is numerically identical since the
    kernel casts to the weight dtype before the MXU anyway).
    Output dtype defaults to the input dtype.
    """
    orig_shape = features.shape
    hidden = orig_shape[-1]
    assert w_t.shape == (hidden, hidden) and b2.shape == (1, hidden)
    out_dtype = features.dtype if out_dtype is None else jnp.dtype(out_dtype)

    x = features.reshape(-1, hidden)
    n = x.shape[0]

    tb, tn, tk, single_w, ktiled = _select_tiles(
        n, hidden,
        jnp.dtype(x.dtype).itemsize, jnp.dtype(out_dtype).itemsize,
        _VMEM_BUDGET, tb_req=tile_batch, tk_req=tile_k)

    n_pad = _round_up(n, tb)
    if n_pad != n:
        # Padded rows just compute tanh(b) and are sliced off (<= 1 extra tile).
        x = jnp.pad(x, ((0, n_pad - n), (0, 0)))

    call = _build_call(n_pad, hidden, tb, tn, tk, x.dtype, out_dtype,
                       single_w, ktiled, _VMEM_BUDGET)
    out = call(x, w_t, b2)

    if n_pad != n:
        out = out[:n]
    return out.reshape(orig_shape)


def mlp_layer_ref(features, weight, bias):
    # Pure-JAX reference matching PyTorch: y = tanh(x @ W.T + b), all f32.
    return jnp.tanh(features.astype(jnp.float32) @ weight.T + bias)


# --------------------------------------------------------------------------
# Self-test
# --------------------------------------------------------------------------

if __name__ == "__main__":
    key = jax.random.PRNGKey(0)
    k_x, k_w, k_b, k_x2 = jax.random.split(key, 4)

    # CoCondenser text-CL head: MLPLayer(768) on paired CLS vectors,
    # z = cls_hiddens.view(batch, 2, -1).
    batch, hidden = 8, 768
    bound = 1.0 / (hidden ** 0.5)          # nn.Linear default init scale
    z = jax.random.normal(k_x, (batch, 2, hidden), dtype=jnp.float32)
    w = jax.random.uniform(k_w, (hidden, hidden), minval=-bound, maxval=bound,
                           dtype=jnp.float32)   # PyTorch layout: [out, in]
    b = jax.random.uniform(k_b, (hidden,), minval=-bound, maxval=bound,
                           dtype=jnp.float32)

    w_t, b2 = prepare_mlp_params(w, b)     # one-time: transpose + bf16 cast

    # 1) Paired-CLS head path (small batch, single grid step).
    out = jax.block_until_ready(mlp_layer(z, w_t, b2))
    ref = mlp_layer_ref(z, w, b)
    assert out.shape == z.shape
    assert jnp.allclose(out, ref, atol=2e-2, rtol=2e-2), "mismatch (paired CLS)"

    # 2) Larger ragged batch, f32 in/out: exercises padding + the >=2-step
    #    "parallel" batch axis (megacore sharding on v7x).
    n_rows = 300
    x_big = jax.random.normal(k_x2, (n_rows, hidden), dtype=jnp.float32)
    ref_big = mlp_layer_ref(x_big, w, b)
    out_big = jax.block_until_ready(mlp_layer(x_big, w_t, b2))
    assert out_big.shape == (n_rows, hidden)
    assert jnp.allclose(out_big, ref_big, atol=2e-2, rtol=2e-2), "mismatch (f32 batch)"

    # 3) bf16 activations in / bf16 out: halves activation HBM traffic.
    out_bf16 = jax.block_until_ready(mlp_layer(x_big.astype(jnp.bfloat16), w_t, b2))
    assert out_bf16.dtype == jnp.bfloat16
    assert jnp.allclose(out_bf16.astype(jnp.float32), ref_big,
                        atol=5e-2, rtol=5e-2), "mismatch (bf16 batch)"

    # 4) Forced K-tiled accumulator path (auto-selected only for very large H).
    out_kt = jax.block_until_ready(mlp_layer(x_big, w_t, b2,
                                             tile_batch=128, tile_k=256))
    assert jnp.allclose(out_kt, ref_big, atol=2e-2, rtol=2e-2), "mismatch (K-tiled)"

    print("KERNEL_OK")
</pallas_src>

<mosaic_0001>
module attributes {stable_mosaic.version = 11 : i64} {
  func.func @_mlp_kernel(%arg0: i32, %arg1: i32, %arg2: memref<16x768xf32, #tpu.memory_space<vmem>>, %arg3: memref<768x768xbf16, #tpu.memory_space<vmem>>, %arg4: memref<1x768xf32, #tpu.memory_space<vmem>>, %arg5: memref<16x768xf32, #tpu.memory_space<vmem>>) attributes {dimension_semantics = [#tpu.dimension_semantics<parallel>, #tpu.dimension_semantics<parallel>], iteration_bounds = array<i64: 1, 1>, scalar_prefetch = 0 : i64, scratch_operands = 0 : i64, tpu.core_type = #tpu.core_type<tc>, window_params = [{transform_indices = @transform_0, window_bounds = array<i64: 16, 768>}, {pipeline_mode = #tpu.pipeline_mode<synchronous>, transform_indices = @transform_1, window_bounds = array<i64: 768, 768>}, {transform_indices = @transform_2, window_bounds = array<i64: 1, 768>}, {transform_indices = @transform_3, window_bounds = array<i64: 16, 768>}]} {
    %c0 = arith.constant 0 : index
    %c0_0 = arith.constant 0 : index
    %0 = vector.load %arg2[%c0, %c0_0] : memref<16x768xf32, #tpu.memory_space<vmem>>, vector<16x768xf32>
    %1 = arith.truncf %0 : vector<16x768xf32> to vector<16x768xbf16>
    %c0_1 = arith.constant 0 : index
    %c0_2 = arith.constant 0 : index
    %2 = vector.load %arg3[%c0_1, %c0_2] : memref<768x768xbf16, #tpu.memory_space<vmem>>, vector<768x768xbf16>
    %cst = arith.constant dense<0.000000e+00> : vector<16x768xf32>
    %3 = tpu.matmul %1, %2, %cst {dimension_numbers = #tpu.dot_dimension_numbers<[1], [0], [0], [1], [0, 0, 1, 1], [], []>} : vector<16x768xbf16>, vector<768x768xbf16>, vector<16x768xf32> -> vector<16x768xf32>
    %c0_3 = arith.constant 0 : index
    %c0_4 = arith.constant 0 : index
    %4 = vector.load %arg4[%c0_3, %c0_4] : memref<1x768xf32, #tpu.memory_space<vmem>>, vector<1x768xf32>
    %5 = vector.broadcast %4 : vector<1x768xf32> to vector<16x768xf32>
    %6 = arith.addf %3, %5 : vector<16x768xf32>
    %7 = math.tanh %6 : vector<16x768xf32>
    %c0_5 = arith.constant 0 : index
    %c0_6 = arith.constant 0 : index
    %8 = vector.load %arg5[%c0_5, %c0_6] : memref<16x768xf32, #tpu.memory_space<vmem>>, vector<16x768xf32>
    tpu.vector_store %arg5[%c0_5, %c0_6], %7 {strides = array<i32>} : memref<16x768xf32, #tpu.memory_space<vmem>>, vector<16x768xf32>,
    return
  }
  func.func @transform_0(%arg0: i32, %arg1: i32) -> (i32, i32) {
    %c0_i32 = arith.constant 0 : i32
    %c0_i32_0 = arith.constant 0 : i32
    return %arg1, %c0_i32 : i32, i32
  }
  func.func @transform_1(%arg0: i32, %arg1: i32) -> (i32, i32) {
    %c0_i32 = arith.constant 0 : i32
    %c0_i32_0 = arith.constant 0 : i32
    return %c0_i32, %arg0 : i32, i32
  }
  func.func @transform_2(%arg0: i32, %arg1: i32) -> (i32, i32) {
    %c0_i32 = arith.constant 0 : i32
    %c0_i32_0 = arith.constant 0 : i32
    return %c0_i32, %arg0 : i32, i32
  }
  func.func @transform_3(%arg0: i32, %arg1: i32) -> (i32, i32) {
    %c0_i32 = arith.constant 0 : i32
    return %arg1, %arg0 : i32, i32
  }
}

</mosaic_0001>

<bundles_post_ra>
// kernel: tpu_custom_call.1
= control target key start
LH: loop header
LB: loop body
LE: loop exit
PB: predicated region body
PF: predicated region fallthrough
CT: control target
= control target key end

     0   :  { %8 = vsyncpa [#allocation3], 0  ;;  %s3191_s0 = inlined_call_operand.hbm [shape: f32[16,768], index: 0, kind: input, shape index: {}]   ;;  %s3192_s1 = inlined_call_operand.hbm [shape: bf16[768,768], index: 1, kind: input, shape index: {}]   ;;  %s3193_s2 = inlined_call_operand.hbm [shape: f32[1,768], index: 2, kind: input, shape index: {}]   ;;  %s3194_s3 = inlined_call_operand.hbm [shape: f32[16,768], index: 3, kind: output, shape index: {}]  }
   0x1   :  { %9 = vsyncpa [#allocation6], 0 }
   0x2   :  { %10 = vsyncpa [#allocation4], 0  ;;  %s3099_s12 = smov [#allocation5]  }
   0x3   :  { %s28_s13 = sshll.u32 %s3099_s12, 4  ;;  %s29_s13 = int_to_ptr.vmem [resolvable:$true] %s28_s13 }
   0x4   :  { %s3021_s14 = scalar_lea.vmem %s29_s13, 36864  ;;  %p3026_p1 = scmp.lt.s32.totalorder %s29_s13, %s29_s13 }
   0x5   :  { %p3022_p0 = scmp.ne.s32.totalorder %s29_s13, %s3021_s14  ;;  %p3027_p2 = scmp.lt.s32.totalorder %s3021_s14, %s3021_s14 }
   0x7   :  { %p3028_p3 = por %p3027_p2, %p3026_p1 }
   0x9   :  { %p3029_p4 = pnand %p3028_p3, %p3022_p0 }
   0xb   :  { %3032 = shalt.err (!%p3029_p4)
}
   0xc   :  { %s3100_s15 = smov 384   ;;  %s3101_s16 = smov 24  }
   0xd   :  { %34 = dma.hbm_to_vmem [thread:$0]  %s3192_s1, 36864, %s29_s13, [#allocation6], %s3100_s15, %s3100_s15, %s3101_s16  }
   0xe   :  { %s3102_s19 = smov [#allocation2]  }
   0xf   :  { %s16_s20 = sshll.u32 %s3102_s19, 4  ;;  %s17_s20 = int_to_ptr.vmem [resolvable:$true] %s16_s20 }
  0x10   :  { %s3041_s21 = scalar_lea.vmem %s17_s20, 1536  ;;  %p3046_p6 = scmp.lt.s32.totalorder %s17_s20, %s17_s20 }
  0x11   :  { %p3042_p5 = scmp.ne.s32.totalorder %s17_s20, %s3041_s21  ;;  %p3047_p7 = scmp.lt.s32.totalorder %s3041_s21, %s3041_s21 }
  0x13   :  { %p3048_p8 = por %p3047_p7, %p3046_p6 }
  0x15   :  { %p3049_p9 = pnand %p3048_p8, %p3042_p5 }
  0x17   :  { %3052 = shalt.err (!%p3049_p9)
}
  0x18   :  { %s3103_s22 = smov 768   ;;  %s3104_s23 = smov 48  }
  0x19   :  { %22 = dma.hbm_to_vmem [thread:$0]  %s3191_s0, 1536, %s17_s20, [#allocation3], %s3103_s22, %s3103_s22, %s3104_s23  }
  0x1a   :  { %s3105_s1 = smov [#allocation7]  }
  0x1b   :  { %s41_s26 = sshll.u32 %s3105_s1, 4  ;;  %s42_s26 = int_to_ptr.vmem [resolvable:$true] %s41_s26 }
  0x1c   :  { %s3061_s27 = scalar_lea.vmem %s42_s26, 96  ;;  %p3066_p11 = scmp.lt.s32.totalorder %s42_s26, %s42_s26 }
  0x1d   :  { %p3062_p10 = scmp.ne.s32.totalorder %s42_s26, %s3061_s27  ;;  %p3067_p12 = scmp.lt.s32.totalorder %s3061_s27, %s3061_s27 }
  0x1f   :  { %p3068_p13 = por %p3067_p12, %p3066_p11 }
  0x21   :  { %p3069_p0 = pnand %p3068_p13, %p3062_p10 }
  0x23   :  { %3072 = shalt.err (!%p3069_p0)
}
  0x24   :  { %44 = dma.hbm_to_vmem [thread:$0]  %s3193_s2, 96, %s42_s26, [#allocation6]  }
  0x25   :  { %3093 = dma.done.wait [#allocation3], 1536  }
  0x26   :  { %3094 = vsyncadd [#allocation3], 4294965760 }
  0x27   :  { %3095 = dma.done.wait [#allocation6], 36960  }
  0x28   :  { %3096 = vsyncadd [#allocation6], 4294930336  ;;  %v2557_v0 = vld [vmem:[#allocation5 + $0x154] ss:$24 sps:$4 sm:$0xff]   ;;  %v2559_v1 = vld [vmem:[#allocation5 + $0x150] ss:$24 sps:$4 sm:$0xff]  }
  0x29   :  { %1832 = vmatprep.subr.bf16.mxu0 %v2557_v0  ;;  %v2560_v2 = vld [vmem:[#allocation5 + $0x454] ss:$24 sps:$4 sm:$0xff]   ;;  %v2562_v3 = vld [vmem:[#allocation5 + $0x450] ss:$24 sps:$4 sm:$0xff]   ;;  %v2563_v4 = vld [vmem:[#allocation5 + $0x124] ss:$24 sps:$4 sm:$0xff]  }
  0x2a   :  { %1833 = vmatpush1.bf16.msra.mxu0 %v2559_v1  ;;  %v2565_v5 = vld [vmem:[#allocation5 + $0x120] ss:$24 sps:$4 sm:$0xff]   ;;  %1875 = vmatprep.subr.bf16.mxu1 %v2560_v2  ;;  %v2566_v6 = vld [vmem:[#allocation5 + $0x424] ss:$24 sps:$4 sm:$0xff]   ;;  %v2569_v8 = vld [vmem:[#allocation5 + $0xf4] ss:$24 sps:$4 sm:$0xff]  }
  0x2b   :  { %1876 = vmatpush1.bf16.msra.mxu1 %v2562_v3  ;;  %1834 = vmatprep.subr.bf16.mxu0 %v2563_v4  ;;  %v2568_v7 = vld [vmem:[#allocation5 + $0x420] ss:$24 sps:$4 sm:$0xff]   ;;  %v2571_v9 = vld [vmem:[#allocation5 + $0xf0] ss:$24 sps:$4 sm:$0xff]   ;;  %v2572_v10 = vld [vmem:[#allocation5 + $0x3f4] ss:$24 sps:$4 sm:$0xff]  }
  0x2c   :  { %1877 = vmatprep.subr.bf16.mxu1 %v2566_v6  ;;  %v2575_v11 = vld [vmem:[#allocation5 + $0xc4] ss:$24 sps:$4 sm:$0xff]   ;;  %v2574_v12 = vld [vmem:[#allocation5 + $0x3f0] ss:$24 sps:$4 sm:$0xff]   ;;  %v2577_v14 = vld [vmem:[#allocation5 + $0xc0] ss:$24 sps:$4 sm:$0xff]  }
  0x2d   :  { %v2578_v13 = vld [vmem:[#allocation5 + $0x3c4] ss:$24 sps:$4 sm:$0xff]   ;;  %v2581_v15 = vld [vmem:[#allocation5 + $0x94] ss:$24 sps:$4 sm:$0xff]   ;;  %v2580_v16 = vld [vmem:[#allocation5 + $0x3c0] ss:$24 sps:$4 sm:$0xff]  }
  0x2e   :  { %1835 = vmatpush1.bf16.msra.mxu0 %v2565_v5  ;;  %v2584_v17 = vld [vmem:[#allocation5 + $0x394] ss:$24 sps:$4 sm:$0xff]   ;;  %v2583_v18 = vld [vmem:[#allocation5 + $0x90] ss:$24 sps:$4 sm:$0xff]   ;;  %v2587_v19 = vld [vmem:[#allocation5 + $0x64] ss:$24 sps:$4 sm:$0xff]  }
  0x2f   :  { %1836 = vmatprep.subr.bf16.mxu0 %v2569_v8  ;;  %1878 = vmatpush1.bf16.msra.mxu1 %v2568_v7  ;;  %v2586_v20 = vld [vmem:[#allocation5 + $0x390] ss:$24 sps:$4 sm:$0xff]   ;;  %v2590_v21 = vld [vmem:[#allocation5 + $0x364] ss:$24 sps:$4 sm:$0xff]   ;;  %v2589_v22 = vld [vmem:[#allocation5 + $0x60] ss:$24 sps:$4 sm:$0xff]  }
  0x30   :  { %1879 = vmatprep.subr.bf16.mxu1 %v2572_v10  ;;  %v2593_v23 = vld [vmem:[#allocation5 + $0x34] ss:$24 sps:$4 sm:$0xff]   ;;  %v2592_v24 = vld [vmem:[#allocation5 + $0x360] ss:$24 sps:$4 sm:$0xff]   ;;  %v2595_v26 = vld [vmem:[#allocation5 + $0x30] ss:$24 sps:$4 sm:$0xff]  }
  0x31   :  { %v2596_v25 = vld [vmem:[#allocation5 + $0x334] ss:$24 sps:$4 sm:$0xff]   ;;  %v2599_v27 = vld [vmem:[#allocation5 + $0x4] ss:$24 sps:$4 sm:$0xff]   ;;  %v2598_v28 = vld [vmem:[#allocation5 + $0x330] ss:$24 sps:$4 sm:$0xff]  }
  0x32   :  { %1837 = vmatpush1.bf16.msra.mxu0 %v2571_v9  ;;  %v2602_v29 = vld [vmem:[#allocation5 + $0x304] ss:$24 sps:$4 sm:$0xff]   ;;  %v2601_v30 = vld [vmem:[#allocation5] ss:$24 sps:$4 sm:$0xff]   ;;  %v2605_v31 = vld [vmem:[#allocation5 + $0x2d4] ss:$24 sps:$4 sm:$0xff]  }
  0x33   :  { %1838 = vmatprep.subr.bf16.mxu0 %v2575_v11  ;;  %1880 = vmatpush1.bf16.msra.mxu1 %v2574_v12  ;;  %v2604_v32 = vld [vmem:[#allocation5 + $0x300] ss:$24 sps:$4 sm:$0xff]   ;;  %v2608_v33 = vld [vmem:[#allocation5 + $0x5d4] ss:$24 sps:$4 sm:$0xff]   ;;  %v2607_v34 = vld [vmem:[#allocation5 + $0x2d0] ss:$24 sps:$4 sm:$0xff]  }
  0x34   :  { %1881 = vmatprep.subr.bf16.mxu1 %v2578_v13  ;;  %v2611_v35 = vld [vmem:[#allocation5 + $0x2a4] ss:$24 sps:$4 sm:$0xff]   ;;  %v2610_v36 = vld [vmem:[#allocation5 + $0x5d0] ss:$24 sps:$4 sm:$0xff]   ;;  %v2613_v38 = vld [vmem:[#allocation5 + $0x2a0] ss:$24 sps:$4 sm:$0xff]  }
  0x35   :  { %v2614_v37 = vld [vmem:[#allocation5 + $0x5a4] ss:$24 sps:$4 sm:$0xff]   ;;  %v2617_v39 = vld [vmem:[#allocation5 + $0x274] ss:$24 sps:$4 sm:$0xff]   ;;  %v2616_v40 = vld [vmem:[#allocation5 + $0x5a0] ss:$24 sps:$4 sm:$0xff]  }
  0x36   :  { %1839 = vmatpush1.bf16.msra.mxu0 %v2577_v14  ;;  %v2620_v41 = vld [vmem:[#allocation5 + $0x574] ss:$24 sps:$4 sm:$0xff]   ;;  %v2619_v42 = vld [vmem:[#allocation5 + $0x270] ss:$24 sps:$4 sm:$0xff]   ;;  %v2623_v43 = vld [vmem:[#allocation5 + $0x244] ss:$24 sps:$4 sm:$0xff]  }
  0x37   :  { %1840 = vmatprep.subr.bf16.mxu0 %v2581_v15  ;;  %1882 = vmatpush1.bf16.msra.mxu1 %v2580_v16  ;;  %v2622_v44 = vld [vmem:[#allocation5 + $0x570] ss:$24 sps:$4 sm:$0xff]   ;;  %v2626_v45 = vld [vmem:[#allocation5 + $0x544] ss:$24 sps:$4 sm:$0xff]   ;;  %v2625_v48 = vld [vmem:[#allocation5 + $0x240] ss:$24 sps:$4 sm:$0xff]  }
  0x38   :  { %1883 = vmatprep.subr.bf16.mxu1 %v2584_v17  ;;  %v55_v46 = vld [vmem:[#allocation2 + $0x8] sm:$0xff]  ;;  %v61_v47 = vld [vmem:[#allocation2 + $0x38] sm:$0xff]  ;;  %v54_v5 = vld [vmem:[#allocation2] sm:$0xff]  ;;  %s3106_s0 = smov [#allocation8]  }
  0x39   :  { %v3139_v49 = vpack.c.bf16 %v61_v47, %v55_v46  ;;  %v2629_v50 = vld [vmem:[#allocation5 + $0x214] ss:$24 sps:$4 sm:$0xff]   ;;  %v2628_v51 = vld [vmem:[#allocation5 + $0x540] ss:$24 sps:$4 sm:$0xff]   ;;  %v2631_v56 = vld [vmem:[#allocation5 + $0x210] ss:$24 sps:$4 sm:$0xff]  }
  0x3a   :  { %1841 = vmatpush1.bf16.msra.mxu0 %v2583_v18  ;;  %v57_v52 = vld [vmem:[#allocation2 + $0x18] sm:$0xff]  ;;  %v63_v53 = vld [vmem:[#allocation2 + $0x48] sm:$0xff]  ;;  %v60_v7 = vld [vmem:[#allocation2 + $0x30] sm:$0xff]  ;;  %s2248_s2 = sshll.u32 %s3106_s0, 4  ;;  %s2249_s2 = int_to_ptr.vmem [resolvable:$true] %s2248_s2 }
  0x3b   :  { %1842 = vmatprep.subr.bf16.mxu0 %v2587_v19  ;;  %1884 = vmatpush1.bf16.msra.mxu1 %v2586_v20  ;;  %v2632_v54 = vld [vmem:[#allocation5 + $0x514] ss:$24 sps:$4 sm:$0xff]   ;;  %v3142_v55 = vpack.c.bf16 %v63_v53, %v57_v52  ;;  %v2635_v57 = vld [vmem:[#allocation5 + $0x1e4] ss:$24 sps:$4 sm:$0xff]   ;;  %v2634_v58 = vld [vmem:[#allocation5 + $0x510] ss:$24 sps:$4 sm:$0xff]   ;;  %v3145_v11 = vpack.c.bf16 %v60_v7, %v54_v5  ;;  %p3078_p2 = scmp.lt.s32.totalorder %s2249_s2, %s2249_s2 }
  0x3c   :  { %1885 = vmatprep.subr.bf16.mxu1 %v2590_v21  ;;  %1864 = vmatprep.mubr.bf16.mxu0 %v3139_v49  ;;  %v2638_v59 = vld [vmem:[#allocation5 + $0x4e4] ss:$24 sps:$4 sm:$0xff]   ;;  %v2637_v60 = vld [vmem:[#allocation5 + $0x1e0] ss:$24 sps:$4 sm:$0xff]   ;;  %v2641_v61 = vld [vmem:[#allocation5 + $0x1b4] ss:$24 sps:$4 sm:$0xff]  }
  0x3d   :  { %1907 = vmatprep.mubr.bf16.mxu1 %v3142_v55  ;;  %v2640_v62 = vld [vmem:[#allocation5 + $0x4e0] ss:$24 sps:$4 sm:$0xff]   ;;  %v2644_v63 = vld [vmem:[#allocation5 + $0x4b4] ss:$24 sps:$4 sm:$0xff]   ;;  %v2643_v0 = vld [vmem:[#allocation5 + $0x1b0] ss:$24 sps:$4 sm:$0xff]  }
  0x3e   :  { %1843 = vmatpush1.bf16.msra.mxu0 %v2589_v22  ;;  %v2646_v1 = vld [vmem:[#allocation5 + $0x4b0] ss:$24 sps:$4 sm:$0xff]   ;;  %v2647_v2 = vld [vmem:[#allocation5 + $0x184] ss:$24 sps:$4 sm:$0xff]   ;;  %v2649_v3 = vld [vmem:[#allocation5 + $0x180] ss:$24 sps:$4 sm:$0xff]  }
  0x3f   :  { %1844 = vmatprep.subr.bf16.mxu0 %v2593_v23  ;;  %1886 = vmatpush1.bf16.msra.mxu1 %v2592_v24  ;;  %v2650_v4 = vld [vmem:[#allocation5 + $0x484] ss:$24 sps:$4 sm:$0xff]   ;;  %v2652_v6 = vld [vmem:[#allocation5 + $0x480] ss:$24 sps:$4 sm:$0xff]   ;;  %v2655_v8 = vld [vmem:[#allocation5 + $0x754] ss:$24 sps:$4 sm:$0xff]  }
  0x40   :  { %1887 = vmatprep.subr.bf16.mxu1 %v2596_v25  ;;  %v56_v9 = vld [vmem:[#allocation2 + $0x10] sm:$0xff]  ;;  %v62_v10 = vld [vmem:[#allocation2 + $0x40] sm:$0xff]  ;;  %s3073_s30 = scalar_lea.vmem %s2249_s2, 1536 }
  0x41   :  { %v2658_v12 = vld [vmem:[#allocation5 + $0x15c] ss:$24 sps:$4 sm:$0xff]   ;;  %v2653_v13 = vld [vmem:[#allocation5 + $0x750] ss:$24 sps:$4 sm:$0xff]   ;;  %v3147_v14 = vpack.c.bf16 %v62_v10, %v56_v9  ;;  %v2664_v17 = vld [vmem:[#allocation5 + $0x12c] ss:$24 sps:$4 sm:$0xff]   ;;  %p3074_p1 = scmp.ne.s32.totalorder %s2249_s2, %s3073_s30  ;;  %p3079_p3 = scmp.lt.s32.totalorder %s3073_s30, %s3073_s30 }
  0x42   :  { %1845 = vmatpush1.bf16.msra.mxu0 %v2595_v26  ;;  %v2661_v15 = vld [vmem:[#allocation5 + $0x724] ss:$24 sps:$4 sm:$0xff]   ;;  %v2656_v16 = vld [vmem:[#allocation5 + $0x158] ss:$24 sps:$4 sm:$0xff]   ;;  %v2667_v19 = vld [vmem:[#allocation5 + $0x6f4] ss:$24 sps:$4 sm:$0xff]  }
  0x43   :  { %1846 = vmatprep.subr.bf16.mxu0 %v2599_v27  ;;  %1888 = vmatpush1.bf16.msra.mxu1 %v2598_v28  ;;  %v2659_v18 = vld [vmem:[#allocation5 + $0x720] ss:$24 sps:$4 sm:$0xff]   ;;  %v2670_v21 = vld [vmem:[#allocation5 + $0xfc] ss:$24 sps:$4 sm:$0xff]   ;;  %v2665_v22 = vld [vmem:[#allocation5 + $0x6f0] ss:$24 sps:$4 sm:$0xff]   ;;  %p3080_p4 = por %p3079_p3, %p3078_p2 }
  0x44   :  { %1889 = vmatprep.subr.bf16.mxu1 %v2602_v29  ;;  %v2662_v20 = vld [vmem:[#allocation5 + $0x128] ss:$24 sps:$4 sm:$0xff]   ;;  %v2673_v23 = vld [vmem:[#allocation5 + $0x6c4] ss:$24 sps:$4 sm:$0xff]   ;;  %v2668_v24 = vld [vmem:[#allocation5 + $0xf8] ss:$24 sps:$4 sm:$0xff]  }
  0x45   :  { %v2676_v25 = vld [vmem:[#allocation5 + $0xcc] ss:$24 sps:$4 sm:$0xff]   ;;  %v2671_v26 = vld [vmem:[#allocation5 + $0x6c0] ss:$24 sps:$4 sm:$0xff]   ;;  %v2682_v29 = vld [vmem:[#allocation5 + $0x9c] ss:$24 sps:$4 sm:$0xff]   ;;  %p3081_p5 = pnand %p3080_p4, %p3074_p1 }
  0x46   :  { %1847 = vmatpush1.bf16.msra.mxu0 %v2601_v30  ;;  %v2679_v27 = vld [vmem:[#allocation5 + $0x694] ss:$24 sps:$4 sm:$0xff]   ;;  %v2674_v28 = vld [vmem:[#allocation5 + $0xc8] ss:$24 sps:$4 sm:$0xff]   ;;  %v2704_v52 = vld [vmem:[#allocation5 + $0x2d8] ss:$24 sps:$4 sm:$0xff]  }
  0x47   :  { %1848 = vmatprep.subr.bf16.mxu0 %v2605_v31  ;;  %1890 = vmatpush1.bf16.msra.mxu1 %v2604_v32  ;;  %v2677_v30 = vld [vmem:[#allocation5 + $0x690] ss:$24 sps:$4 sm:$0xff]   ;;  %v2685_v31 = vld [vmem:[#allocation5 + $0x664] ss:$24 sps:$4 sm:$0xff]   ;;  %v2703_v46 = vld [vmem:[#allocation5 + $0x8d4] ss:$24 sps:$4 sm:$0xff]  }
  0x48   :  { %1891 = vmatprep.subr.bf16.mxu1 %v2608_v33  ;;  %v2680_v32 = vld [vmem:[#allocation5 + $0x98] ss:$24 sps:$4 sm:$0xff]   ;;  %v2688_v33 = vld [vmem:[#allocation5 + $0x6c] ss:$24 sps:$4 sm:$0xff]   ;;  %v2698_v47 = vld [vmem:[#allocation5 + $0x8] ss:$24 sps:$4 sm:$0xff]  }
  0x49   :  { %v2712_v53 = vld [vmem:[#allocation5 + $0x2ac] ss:$24 sps:$4 sm:$0xff]   ;;  %v2728_v5 = vld [vmem:[#allocation5 + $0x218] ss:$24 sps:$4 sm:$0xff]   ;;  %v2734_v9 = vld [vmem:[#allocation5 + $0x1e8] ss:$24 sps:$4 sm:$0xff]  }
  0x4a   :  { %1849 = vmatpush2.bf16.msra.mxu0 %v2607_v34  ;;  %v2683_v34 = vld [vmem:[#allocation5 + $0x660] ss:$24 sps:$4 sm:$0xff]   ;;  %v2742_v10 = vld [vmem:[#allocation5 + $0x1bc] ss:$24 sps:$4 sm:$0xff]  }
  0x4b   :  { %1850 = vmatprep.subr.bf16.mxu0 %v2611_v35  ;;  %1892 = vmatpush2.bf16.msra.mxu1 %v2610_v36  ;;  %v2691_v35 = vld [vmem:[#allocation5 + $0x634] ss:$24 sps:$4 sm:$0xff]   ;;  %v2686_v36 = vld [vmem:[#allocation5 + $0x68] ss:$24 sps:$4 sm:$0xff]  }
  0x4c   :  { %1893 = vmatprep.subr.bf16.mxu1 %v2614_v37  ;;  %v2694_v37 = vld [vmem:[#allocation5 + $0x3c] ss:$24 sps:$4 sm:$0xff]   ;;  %v2731_v7 = vld [vmem:[#allocation5 + $0x7e0] ss:$24 sps:$4 sm:$0xff]  }
  0x4e   :  { %1851 = vmatpush2.bf16.msra.mxu0 %v2613_v38  ;;  %v2689_v38 = vld [vmem:[#allocation5 + $0x630] ss:$24 sps:$4 sm:$0xff]  }
  0x4f   :  { %1852 = vmatprep.subr.bf16.mxu0 %v2617_v39  ;;  %1894 = vmatpush2.bf16.msra.mxu1 %v2616_v40  ;;  %v2697_v39 = vld [vmem:[#allocation5 + $0x604] ss:$24 sps:$4 sm:$0xff]   ;;  %v59_v40 = vld [vmem:[#allocation2 + $0x28] sm:$0xff] }
  0x50   :  { %1895 = vmatprep.subr.bf16.mxu1 %v2620_v41  ;;  %v65_v41 = vld [vmem:[#allocation2 + $0x58] sm:$0xff] }
  0x52   :  { %1853 = vmatpush2.bf16.msra.mxu0 %v2619_v42  ;;  %v2692_v42 = vld [vmem:[#allocation5 + $0x38] ss:$24 sps:$4 sm:$0xff]  }
  0x53   :  { %1854 = vmatprep.subr.bf16.mxu0 %v2623_v43  ;;  %1896 = vmatpush2.bf16.msra.mxu1 %v2622_v44  ;;  %v3152_v43 = vpack.c.bf16 %v65_v41, %v59_v40  ;;  %v2700_v44 = vld [vmem:[#allocation5 + $0xc] ss:$24 sps:$4 sm:$0xff]   ;;  %v2773_v40 = vld [vmem:[#allocation5 + $0x398] ss:$24 sps:$4 sm:$0xff]  }
  0x54   :  { %1897 = vmatprep.subr.bf16.mxu1 %v2626_v45  ;;  %v2695_v45 = vld [vmem:[#allocation5 + $0x600] ss:$24 sps:$4 sm:$0xff]   ;;  %v2781_v41 = vld [vmem:[#allocation5 + $0x36c] ss:$24 sps:$4 sm:$0xff]  }
  0x56   :  { %1855 = vmatpush2.bf16.msra.mxu0 %v2625_v48  ;;  %v2706_v48 = vld [vmem:[#allocation5 + $0x2dc] ss:$24 sps:$4 sm:$0xff]  }
  0x57   :  { %1856 = vmatprep.subr.bf16.mxu0 %v2629_v50  ;;  %1898 = vmatpush2.bf16.msra.mxu1 %v2628_v51  ;;  %v2701_v50 = vld [vmem:[#allocation5 + $0x8d0] ss:$24 sps:$4 sm:$0xff]   ;;  %v2709_v51 = vld [vmem:[#allocation5 + $0x8a4] ss:$24 sps:$4 sm:$0xff]  }
  0x58   :  { %1899 = vmatprep.subr.bf16.mxu1 %v2632_v54  ;;  %v2707_v54 = vld [vmem:[#allocation5 + $0x8a0] ss:$24 sps:$4 sm:$0xff]  }
  0x5a   :  { %1857 = vmatpush2.bf16.msra.mxu0 %v2631_v56  ;;  %v2715_v56 = vld [vmem:[#allocation5 + $0x874] ss:$24 sps:$4 sm:$0xff]  }
  0x5b   :  { %1858 = vmatprep.subr.bf16.mxu0 %v2635_v57  ;;  %1900 = vmatpush2.bf16.msra.mxu1 %v2634_v58  ;;  %v2710_v57 = vld [vmem:[#allocation5 + $0x2a8] ss:$24 sps:$4 sm:$0xff]   ;;  %v2718_v58 = vld [vmem:[#allocation5 + $0x27c] ss:$24 sps:$4 sm:$0xff]  }
  0x5c   :  { %1901 = vmatprep.subr.bf16.mxu1 %v2638_v59  ;;  %v2713_v59 = vld [vmem:[#allocation5 + $0x870] ss:$24 sps:$4 sm:$0xff]  }
  0x5e   :  { %1859 = vmatpush2.bf16.msra.mxu0 %v2637_v60  ;;  %v2721_v60 = vld [vmem:[#allocation5 + $0x844] ss:$24 sps:$4 sm:$0xff]  }
  0x5f   :  { %1860 = vmatprep.subr.bf16.mxu0 %v2641_v61  ;;  %1902 = vmatpush2.bf16.msra.mxu1 %v2640_v62  ;;  %v2716_v61 = vld [vmem:[#allocation5 + $0x278] ss:$24 sps:$4 sm:$0xff]   ;;  %v2724_v62 = vld [vmem:[#allocation5 + $0x24c] ss:$24 sps:$4 sm:$0xff]  }
  0x60   :  { %1903 = vmatprep.subr.bf16.mxu1 %v2644_v63  ;;  %v2719_v63 = vld [vmem:[#allocation5 + $0x840] ss:$24 sps:$4 sm:$0xff]  }
  0x62   :  { %1861 = vmatpush2.bf16.msra.mxu0 %v2643_v0  ;;  %v2727_v0 = vld [vmem:[#allocation5 + $0x814] ss:$24 sps:$4 sm:$0xff]  }
  0x63   :  { %1862 = vmatprep.subr.bf16.mxu0 %v2647_v2  ;;  %1904 = vmatpush2.bf16.msra.mxu1 %v2646_v1  ;;  %v2722_v1 = vld [vmem:[#allocation5 + $0x248] ss:$24 sps:$4 sm:$0xff]   ;;  %v2730_v2 = vld [vmem:[#allocation5 + $0x21c] ss:$24 sps:$4 sm:$0xff]  }
  0x64   :  { %1905 = vmatprep.subr.bf16.mxu1 %v2650_v4  ;;  %v2733_v4 = vld [vmem:[#allocation5 + $0x7e4] ss:$24 sps:$4 sm:$0xff]  }
  0x66   :  { %1863 = vmatpush2.bf16.msra.mxu0 %v2649_v3  ;;  %v2725_v3 = vld [vmem:[#allocation5 + $0x810] ss:$24 sps:$4 sm:$0xff]  }
  0x67   :  { %1918 = vmatprep.subr.bf16.mxu0 %v2655_v8  ;;  %1906 = vmatpush2.bf16.msra.mxu1 %v2652_v6  ;;  %v2736_v6 = vld [vmem:[#allocation5 + $0x1ec] ss:$24 sps:$4 sm:$0xff]  }
  0x68   :  { %1961 = vmatprep.subr.bf16.mxu1 %v2658_v12  ;;  %v2739_v8 = vld [vmem:[#allocation5 + $0x7b4] ss:$24 sps:$4 sm:$0xff]   ;;  %v2737_v12 = vld [vmem:[#allocation5 + $0x7b0] ss:$24 sps:$4 sm:$0xff]  }
  0x69   :  { %1865 = vmatmul.mubr.bf16.vlgmr.msra.gmra.mxu0 %v3145_v11 }
  0x6a   :  { %1919 = vmatpush1.bf16.msra.mxu0 %v2653_v13  ;;  %1908 = vmatmul.mubr.bf16.vlgmr.msra.gmra.mxu1 %v3147_v14  ;;  %v2745_v13 = vld [vmem:[#allocation5 + $0x784] ss:$24 sps:$4 sm:$0xff]  }
  0x6b   :  { %1920 = vmatprep.subr.bf16.mxu0 %v2661_v15  ;;  %1962 = vmatpush1.bf16.msra.mxu1 %v2656_v16  ;;  %v2740_v15 = vld [vmem:[#allocation5 + $0x1b8] ss:$24 sps:$4 sm:$0xff]  }
  0x6c   :  { %1993 = vmatprep.mubr.bf16.mxu1 %v3139_v49  ;;  %1963 = vmatprep.subr.bf16.mxu1 %v2664_v17  ;;  %v2743_v16 = vld [vmem:[#allocation5 + $0x780] ss:$24 sps:$4 sm:$0xff]   ;;  %v2748_v17 = vld [vmem:[#allocation5 + $0x18c] ss:$24 sps:$4 sm:$0xff]  }
  0x6d   :  { %1950 = vmatprep.mubr.bf16.mxu0 %v3152_v43 }
  0x6e   :  { %1921 = vmatpush1.bf16.msra.mxu0 %v2659_v18  ;;  %v58_v18 = vld [vmem:[#allocation2 + $0x20] sm:$0xff] }
  0x6f   :  { %1922 = vmatprep.subr.bf16.mxu0 %v2667_v19  ;;  %1964 = vmatpush1.bf16.msra.mxu1 %v2662_v20  ;;  %v64_v19 = vld [vmem:[#allocation2 + $0x50] sm:$0xff] }
  0x70   :  { %1965 = vmatprep.subr.bf16.mxu1 %v2670_v21  ;;  %v2751_v20 = vld [vmem:[#allocation5 + $0x45c] ss:$24 sps:$4 sm:$0xff]   ;;  %v2746_v21 = vld [vmem:[#allocation5 + $0x188] ss:$24 sps:$4 sm:$0xff]  }
  0x72   :  { %1923 = vmatpush1.bf16.msra.mxu0 %v2665_v22  ;;  %v3155_v22 = vpack.c.bf16 %v64_v19, %v58_v18  ;;  %v2835_v18 = vld [vmem:[#allocation5 + $0x4bc] ss:$24 sps:$4 sm:$0xff]   ;;  %v2830_v19 = vld [vmem:[#allocation5 + $0x7e8] ss:$24 sps:$4 sm:$0xff]  }
  0x73   :  { %1924 = vmatprep.subr.bf16.mxu0 %v2673_v23  ;;  %1966 = vmatpush1.bf16.msra.mxu1 %v2668_v24  ;;  %v2754_v23 = vld [vmem:[#allocation5 + $0x75c] ss:$24 sps:$4 sm:$0xff]   ;;  %v2749_v24 = vld [vmem:[#allocation5 + $0x458] ss:$24 sps:$4 sm:$0xff]  }
  0x74   :  { %1967 = vmatprep.subr.bf16.mxu1 %v2676_v25  ;;  %v2757_v25 = vld [vmem:[#allocation5 + $0x42c] ss:$24 sps:$4 sm:$0xff]  }
  0x76   :  { %1925 = vmatpush1.bf16.msra.mxu0 %v2671_v26  ;;  %v2752_v26 = vld [vmem:[#allocation5 + $0x758] ss:$24 sps:$4 sm:$0xff]  }
  0x77   :  { %1926 = vmatprep.subr.bf16.mxu0 %v2679_v27  ;;  %1968 = vmatpush1.bf16.msra.mxu1 %v2674_v28  ;;  %v2760_v27 = vld [vmem:[#allocation5 + $0x72c] ss:$24 sps:$4 sm:$0xff]   ;;  %v2755_v28 = vld [vmem:[#allocation5 + $0x428] ss:$24 sps:$4 sm:$0xff]  }
  0x78   :  { %1969 = vmatprep.subr.bf16.mxu1 %v2682_v29  ;;  %v2763_v29 = vld [vmem:[#allocation5 + $0x3fc] ss:$24 sps:$4 sm:$0xff]  }
  0x7a   :  { %1927 = vmatpush1.bf16.msra.mxu0 %v2677_v30  ;;  %v2758_v30 = vld [vmem:[#allocation5 + $0x728] ss:$24 sps:$4 sm:$0xff]  }
  0x7b   :  { %1928 = vmatprep.subr.bf16.mxu0 %v2685_v31  ;;  %1970 = vmatpush1.bf16.msra.mxu1 %v2680_v32  ;;  %v2766_v31 = vld [vmem:[#allocation5 + $0x6fc] ss:$24 sps:$4 sm:$0xff]   ;;  %v2761_v32 = vld [vmem:[#allocation5 + $0x3f8] ss:$24 sps:$4 sm:$0xff]  }
  0x7c   :  { %1971 = vmatprep.subr.bf16.mxu1 %v2688_v33  ;;  %v2769_v33 = vld [vmem:[#allocation5 + $0x3cc] ss:$24 sps:$4 sm:$0xff]  }
  0x7e   :  { %1929 = vmatpush1.bf16.msra.mxu0 %v2683_v34  ;;  %v2764_v34 = vld [vmem:[#allocation5 + $0x6f8] ss:$24 sps:$4 sm:$0xff]  }
  0x7f   :  { %1930 = vmatprep.subr.bf16.mxu0 %v2691_v35  ;;  %1972 = vmatpush1.bf16.msra.mxu1 %v2686_v36  ;;  %v2772_v35 = vld [vmem:[#allocation5 + $0x6cc] ss:$24 sps:$4 sm:$0xff]   ;;  %v2767_v36 = vld [vmem:[#allocation5 + $0x3c8] ss:$24 sps:$4 sm:$0xff]  }
  0x80   :  { %1973 = vmatprep.subr.bf16.mxu1 %v2694_v37  ;;  %v2775_v37 = vld [vmem:[#allocation5 + $0x39c] ss:$24 sps:$4 sm:$0xff]  }
  0x82   :  { %1931 = vmatpush1.bf16.msra.mxu0 %v2689_v38  ;;  %v2770_v38 = vld [vmem:[#allocation5 + $0x6c8] ss:$24 sps:$4 sm:$0xff]  }
  0x83   :  { %1932 = vmatprep.subr.bf16.mxu0 %v2697_v39  ;;  %1974 = vmatpush1.bf16.msra.mxu1 %v2692_v42  ;;  %v2778_v39 = vld [vmem:[#allocation5 + $0x69c] ss:$24 sps:$4 sm:$0xff]   ;;  %v2776_v42 = vld [vmem:[#allocation5 + $0x698] ss:$24 sps:$4 sm:$0xff]  }
  0x84   :  { %1975 = vmatprep.subr.bf16.mxu1 %v2700_v44  ;;  %v2784_v44 = vld [vmem:[#allocation5 + $0x66c] ss:$24 sps:$4 sm:$0xff]  }
  0x86   :  { %1933 = vmatpush1.bf16.msra.mxu0 %v2695_v45  ;;  %v2779_v45 = vld [vmem:[#allocation5 + $0x368] ss:$24 sps:$4 sm:$0xff]  }
  0x87   :  { %1934 = vmatprep.subr.bf16.mxu0 %v2703_v46  ;;  %1976 = vmatpush1.bf16.msra.mxu1 %v2698_v47  ;;  %v2787_v46 = vld [vmem:[#allocation5 + $0x33c] ss:$24 sps:$4 sm:$0xff]   ;;  %v2782_v47 = vld [vmem:[#allocation5 + $0x668] ss:$24 sps:$4 sm:$0xff]  }
  0x88   :  { %1977 = vmatprep.subr.bf16.mxu1 %v2706_v48  ;;  %v2790_v48 = vld [vmem:[#allocation5 + $0x63c] ss:$24 sps:$4 sm:$0xff]  }
  0x8a   :  { %1935 = vmatpush2.bf16.msra.mxu0 %v2701_v50  ;;  %v2785_v50 = vld [vmem:[#allocation5 + $0x338] ss:$24 sps:$4 sm:$0xff]  }
  0x8b   :  { %1936 = vmatprep.subr.bf16.mxu0 %v2709_v51  ;;  %1978 = vmatpush2.bf16.msra.mxu1 %v2704_v52  ;;  %v2793_v51 = vld [vmem:[#allocation5 + $0x30c] ss:$24 sps:$4 sm:$0xff]   ;;  %v2788_v52 = vld [vmem:[#allocation5 + $0x638] ss:$24 sps:$4 sm:$0xff]  }
  0x8c   :  { %1979 = vmatprep.subr.bf16.mxu1 %v2712_v53  ;;  %v2796_v53 = vld [vmem:[#allocation5 + $0x60c] ss:$24 sps:$4 sm:$0xff]  }
  0x8e   :  { %1937 = vmatpush2.bf16.msra.mxu0 %v2707_v54  ;;  %v2791_v54 = vld [vmem:[#allocation5 + $0x308] ss:$24 sps:$4 sm:$0xff]  }
  0x8f   :  { %1938 = vmatprep.subr.bf16.mxu0 %v2715_v56  ;;  %1980 = vmatpush2.bf16.msra.mxu1 %v2710_v57  ;;  %v2799_v56 = vld [vmem:[#allocation5 + $0x5dc] ss:$24 sps:$4 sm:$0xff]   ;;  %v2794_v57 = vld [vmem:[#allocation5 + $0x608] ss:$24 sps:$4 sm:$0xff]  }
  0x90   :  { %1981 = vmatprep.subr.bf16.mxu1 %v2718_v58  ;;  %v2802_v58 = vld [vmem:[#allocation5 + $0x8dc] ss:$24 sps:$4 sm:$0xff]  }
  0x92   :  { %1939 = vmatpush2.bf16.msra.mxu0 %v2713_v59  ;;  %v2797_v59 = vld [vmem:[#allocation5 + $0x5d8] ss:$24 sps:$4 sm:$0xff]  }
  0x93   :  { %1940 = vmatprep.subr.bf16.mxu0 %v2721_v60  ;;  %1982 = vmatpush2.bf16.msra.mxu1 %v2716_v61  ;;  %v2805_v60 = vld [vmem:[#allocation5 + $0x5ac] ss:$24 sps:$4 sm:$0xff]   ;;  %v2800_v61 = vld [vmem:[#allocation5 + $0x8d8] ss:$24 sps:$4 sm:$0xff]  }
  0x94   :  { %1983 = vmatprep.subr.bf16.mxu1 %v2724_v62  ;;  %v2808_v62 = vld [vmem:[#allocation5 + $0x8ac] ss:$24 sps:$4 sm:$0xff]  }
  0x96   :  { %1941 = vmatpush2.bf16.msra.mxu0 %v2719_v63  ;;  %v2803_v63 = vld [vmem:[#allocation5 + $0x5a8] ss:$24 sps:$4 sm:$0xff]  }
  0x97   :  { %1942 = vmatprep.subr.bf16.mxu0 %v2727_v0  ;;  %1984 = vmatpush2.bf16.msra.mxu1 %v2722_v1  ;;  %v2811_v0 = vld [vmem:[#allocation5 + $0x57c] ss:$24 sps:$4 sm:$0xff]   ;;  %v2806_v1 = vld [vmem:[#allocation5 + $0x8a8] ss:$24 sps:$4 sm:$0xff]  }
  0x98   :  { %1985 = vmatprep.subr.bf16.mxu1 %v2730_v2  ;;  %v2814_v2 = vld [vmem:[#allocation5 + $0x87c] ss:$24 sps:$4 sm:$0xff]  }
  0x9a   :  { %1943 = vmatpush2.bf16.msra.mxu0 %v2725_v3  ;;  %v2809_v3 = vld [vmem:[#allocation5 + $0x578] ss:$24 sps:$4 sm:$0xff]  }
  0x9b   :  { %1944 = vmatprep.subr.bf16.mxu0 %v2733_v4  ;;  %1986 = vmatpush2.bf16.msra.mxu1 %v2728_v5  ;;  %v2817_v4 = vld [vmem:[#allocation5 + $0x54c] ss:$24 sps:$4 sm:$0xff]   ;;  %v2812_v5 = vld [vmem:[#allocation5 + $0x878] ss:$24 sps:$4 sm:$0xff]  }
  0x9c   :  { %1987 = vmatprep.subr.bf16.mxu1 %v2736_v6  ;;  %v2820_v6 = vld [vmem:[#allocation5 + $0x84c] ss:$24 sps:$4 sm:$0xff]  }
  0x9e   :  { %1945 = vmatpush2.bf16.msra.mxu0 %v2731_v7  ;;  %v2815_v7 = vld [vmem:[#allocation5 + $0x548] ss:$24 sps:$4 sm:$0xff]  }
  0x9f   :  { %1946 = vmatprep.subr.bf16.mxu0 %v2739_v8  ;;  %1988 = vmatpush2.bf16.msra.mxu1 %v2734_v9  ;;  %v2823_v8 = vld [vmem:[#allocation5 + $0x51c] ss:$24 sps:$4 sm:$0xff]   ;;  %v2818_v9 = vld [vmem:[#allocation5 + $0x848] ss:$24 sps:$4 sm:$0xff]  }
  0xa0   :  { %1989 = vmatprep.subr.bf16.mxu1 %v2742_v10  ;;  %v2826_v10 = vld [vmem:[#allocation5 + $0x81c] ss:$24 sps:$4 sm:$0xff]  }
  0xa2   :  { %1947 = vmatpush2.bf16.msra.mxu0 %v2737_v12  ;;  %v2821_v12 = vld [vmem:[#allocation5 + $0x518] ss:$24 sps:$4 sm:$0xff]  }
  0xa3   :  { %1948 = vmatprep.subr.bf16.mxu0 %v2745_v13  ;;  %1990 = vmatpush2.bf16.msra.mxu1 %v2740_v15  ;;  %v2829_v13 = vld [vmem:[#allocation5 + $0x4ec] ss:$24 sps:$4 sm:$0xff]   ;;  %v2824_v15 = vld [vmem:[#allocation5 + $0x818] ss:$24 sps:$4 sm:$0xff]  }
  0xa4   :  { %1991 = vmatprep.subr.bf16.mxu1 %v2748_v17  ;;  %v2827_v17 = vld [vmem:[#allocation5 + $0x4e8] ss:$24 sps:$4 sm:$0xff]  }
  0xa6   :  { %1949 = vmatpush2.bf16.msra.mxu0 %v2743_v16  ;;  %v2832_v16 = vld [vmem:[#allocation5 + $0x7ec] ss:$24 sps:$4 sm:$0xff]  }
  0xa7   :  { %2004 = vmatprep.subr.bf16.mxu0 %v2751_v20  ;;  %1992 = vmatpush2.bf16.msra.mxu1 %v2746_v21  ;;  %v2838_v20 = vld [vmem:[#allocation5 + $0x7bc] ss:$24 sps:$4 sm:$0xff]   ;;  %v2833_v21 = vld [vmem:[#allocation5 + $0x4b8] ss:$24 sps:$4 sm:$0xff]  }
  0xa8   :  { %2047 = vmatprep.subr.bf16.mxu1 %v2754_v23  ;;  %v2841_v23 = vld [vmem:[#allocation5 + $0x48c] ss:$24 sps:$4 sm:$0xff]  }
  0xa9   :  { %1951 = vmatmul.mubr.bf16.vlgmr.msra.gmra.mxu0 %v3155_v22 }
  0xaa   :  { %2005 = vmatpush1.bf16.msra.mxu0 %v2749_v24  ;;  %2036 = vmatprep.mubr.bf16.mxu0 %v3142_v55  ;;  %v2836_v24 = vld [vmem:[#allocation5 + $0x7b8] ss:$24 sps:$4 sm:$0xff]  }
  0xab   :  { %1994 = vmatmul.mubr.bf16.vlgmr.msra.gmra.mxu1 %v3145_v11  ;;  %2006 = vmatprep.subr.bf16.mxu0 %v2757_v25  ;;  %v2844_v25 = vld [vmem:[#allocation5 + $0x78c] ss:$24 sps:$4 sm:$0xff]  }
  0xac   :  { %2048 = vmatpush1.bf16.msra.mxu1 %v2752_v26  ;;  %2079 = vmatprep.mubr.bf16.mxu1 %v3152_v43  ;;  %v2839_v26 = vld [vmem:[#allocation5 + $0x488] ss:$24 sps:$4 sm:$0xff]  }
  0xad   :  { %2049 = vmatprep.subr.bf16.mxu1 %v2760_v27  ;;  %v2847_v27 = vld [vmem:[#allocation5 + $0x164] ss:$24 sps:$4 sm:$0xff]  }
  0xae   :  { %2007 = vmatpush1.bf16.msra.mxu0 %v2755_v28  ;;  %v2842_v28 = vld [vmem:[#allocation5 + $0x788] ss:$24 sps:$4 sm:$0xff]  }
  0xaf   :  { %2008 = vmatprep.subr.bf16.mxu0 %v2763_v29  ;;  %v2850_v29 = vld [vmem:[#allocation5 + $0x464] ss:$24 sps:$4 sm:$0xff]  }
  0xb0   :  { %2050 = vmatpush1.bf16.msra.mxu1 %v2758_v30  ;;  %v2845_v30 = vld [vmem:[#allocation5 + $0x160] ss:$24 sps:$4 sm:$0xff]  }
  0xb1   :  { %2051 = vmatprep.subr.bf16.mxu1 %v2766_v31  ;;  %v2853_v31 = vld [vmem:[#allocation5 + $0x134] ss:$24 sps:$4 sm:$0xff]  }
  0xb2   :  { %2009 = vmatpush1.bf16.msra.mxu0 %v2761_v32  ;;  %v2848_v32 = vld [vmem:[#allocation5 + $0x460] ss:$24 sps:$4 sm:$0xff]  }
  0xb3   :  { %2010 = vmatprep.subr.bf16.mxu0 %v2769_v33  ;;  %v2856_v33 = vld [vmem:[#allocation5 + $0x434] ss:$24 sps:$4 sm:$0xff]  }
  0xb4   :  { %2052 = vmatpush1.bf16.msra.mxu1 %v2764_v34  ;;  %v2851_v34 = vld [vmem:[#allocation5 + $0x130] ss:$24 sps:$4 sm:$0xff]  }
  0xb5   :  { %2053 = vmatprep.subr.bf16.mxu1 %v2772_v35  ;;  %v2859_v35 = vld [vmem:[#allocation5 + $0x104] ss:$24 sps:$4 sm:$0xff]  }
  0xb6   :  { %2011 = vmatpush1.bf16.msra.mxu0 %v2767_v36  ;;  %v2854_v36 = vld [vmem:[#allocation5 + $0x430] ss:$24 sps:$4 sm:$0xff]  }
  0xb7   :  { %2012 = vmatprep.subr.bf16.mxu0 %v2775_v37  ;;  %v2862_v37 = vld [vmem:[#allocation5 + $0x404] ss:$24 sps:$4 sm:$0xff]  }
  0xb8   :  { %2054 = vmatpush1.bf16.msra.mxu1 %v2770_v38  ;;  %v2857_v38 = vld [vmem:[#allocation5 + $0x100] ss:$24 sps:$4 sm:$0xff]  }
  0xb9   :  { %2055 = vmatprep.subr.bf16.mxu1 %v2778_v39  ;;  %v2865_v39 = vld [vmem:[#allocation5 + $0xd4] ss:$24 sps:$4 sm:$0xff]  }
  0xba   :  { %2013 = vmatpush1.bf16.msra.mxu0 %v2773_v40  ;;  %v2860_v40 = vld [vmem:[#allocation5 + $0x400] ss:$24 sps:$4 sm:$0xff]  }
  0xbb   :  { %2014 = vmatprep.subr.bf16.mxu0 %v2781_v41  ;;  %v2868_v41 = vld [vmem:[#allocation5 + $0x3d4] ss:$24 sps:$4 sm:$0xff]  }
  0xbc   :  { %2056 = vmatpush1.bf16.msra.mxu1 %v2776_v42  ;;  %v2871_v42 = vld [vmem:[#allocation5 + $0xa4] ss:$24 sps:$4 sm:$0xff]  }
  0xbd   :  { %2057 = vmatprep.subr.bf16.mxu1 %v2784_v44  ;;  %v2866_v44 = vld [vmem:[#allocation5 + $0x3d0] ss:$24 sps:$4 sm:$0xff]  }
  0xbe   :  { %2015 = vmatpush1.bf16.msra.mxu0 %v2779_v45  ;;  %v2874_v45 = vld [vmem:[#allocation5 + $0x3a4] ss:$24 sps:$4 sm:$0xff]  }
  0xbf   :  { %2016 = vmatprep.subr.bf16.mxu0 %v2787_v46  ;;  %v2877_v46 = vld [vmem:[#allocation5 + $0x74] ss:$24 sps:$4 sm:$0xff]  }
  0xc0   :  { %2058 = vmatpush1.bf16.msra.mxu1 %v2782_v47  ;;  %v2872_v47 = vld [vmem:[#allocation5 + $0x3a0] ss:$24 sps:$4 sm:$0xff]  }
  0xc1   :  { %2059 = vmatprep.subr.bf16.mxu1 %v2790_v48  ;;  %v2880_v48 = vld [vmem:[#allocation5 + $0x374] ss:$24 sps:$4 sm:$0xff]  }
  0xc2   :  { %2017 = vmatpush1.bf16.msra.mxu0 %v2785_v50  ;;  %v2875_v50 = vld [vmem:[#allocation5 + $0x70] ss:$24 sps:$4 sm:$0xff]  }
  0xc3   :  { %2018 = vmatprep.subr.bf16.mxu0 %v2793_v51  ;;  %v2883_v51 = vld [vmem:[#allocation5 + $0x44] ss:$24 sps:$4 sm:$0xff]  }
  0xc4   :  { %2060 = vmatpush1.bf16.msra.mxu1 %v2788_v52  ;;  %v2878_v52 = vld [vmem:[#allocation5 + $0x370] ss:$24 sps:$4 sm:$0xff]  }
  0xc5   :  { %2061 = vmatprep.subr.bf16.mxu1 %v2796_v53  ;;  %v2886_v53 = vld [vmem:[#allocation5 + $0x344] ss:$24 sps:$4 sm:$0xff]  }
  0xc6   :  { %2019 = vmatpush1.bf16.msra.mxu0 %v2791_v54  ;;  %v2881_v54 = vld [vmem:[#allocation5 + $0x40] ss:$24 sps:$4 sm:$0xff]  }
  0xc7   :  { %2020 = vmatprep.subr.bf16.mxu0 %v2799_v56  ;;  %v2889_v56 = vld [vmem:[#allocation5 + $0x14] ss:$24 sps:$4 sm:$0xff]  }
  0xc8   :  { %2062 = vmatpush1.bf16.msra.mxu1 %v2794_v57  ;;  %v2884_v57 = vld [vmem:[#allocation5 + $0x340] ss:$24 sps:$4 sm:$0xff]  }
  0xc9   :  { %2063 = vmatprep.subr.bf16.mxu1 %v2802_v58  ;;  %v2892_v58 = vld [vmem:[#allocation5 + $0x314] ss:$24 sps:$4 sm:$0xff]  }
  0xca   :  { %2021 = vmatpush2.bf16.msra.mxu0 %v2797_v59  ;;  %v2887_v59 = vld [vmem:[#allocation5 + $0x10] ss:$24 sps:$4 sm:$0xff]  }
  0xcb   :  { %2022 = vmatprep.subr.bf16.mxu0 %v2805_v60  ;;  %v2895_v60 = vld [vmem:[#allocation5 + $0x2e4] ss:$24 sps:$4 sm:$0xff]  }
  0xcc   :  { %2064 = vmatpush2.bf16.msra.mxu1 %v2800_v61  ;;  %v2890_v61 = vld [vmem:[#allocation5 + $0x310] ss:$24 sps:$4 sm:$0xff]  }
  0xcd   :  { %2065 = vmatprep.subr.bf16.mxu1 %v2808_v62  ;;  %v2898_v62 = vld [vmem:[#allocation5 + $0x5e4] ss:$24 sps:$4 sm:$0xff]  }
  0xce   :  { %2023 = vmatpush2.bf16.msra.mxu0 %v2803_v63  ;;  %v2893_v63 = vld [vmem:[#allocation5 + $0x2e0] ss:$24 sps:$4 sm:$0xff]  }
  0xcf   :  { %2024 = vmatprep.subr.bf16.mxu0 %v2811_v0  ;;  %v2901_v0 = vld [vmem:[#allocation5 + $0x2b4] ss:$24 sps:$4 sm:$0xff]  }
  0xd0   :  { %2066 = vmatpush2.bf16.msra.mxu1 %v2806_v1  ;;  %v2896_v1 = vld [vmem:[#allocation5 + $0x5e0] ss:$24 sps:$4 sm:$0xff]  }
  0xd1   :  { %2067 = vmatprep.subr.bf16.mxu1 %v2814_v2  ;;  %v2904_v2 = vld [vmem:[#allocation5 + $0x5b4] ss:$24 sps:$4 sm:$0xff]  }
  0xd2   :  { %2025 = vmatpush2.bf16.msra.mxu0 %v2809_v3  ;;  %v2899_v3 = vld [vmem:[#allocation5 + $0x2b0] ss:$24 sps:$4 sm:$0xff]  }
  0xd3   :  { %2026 = vmatprep.subr.bf16.mxu0 %v2817_v4  ;;  %v2907_v4 = vld [vmem:[#allocation5 + $0x284] ss:$24 sps:$4 sm:$0xff]  }
  0xd4   :  { %2068 = vmatpush2.bf16.msra.mxu1 %v2812_v5  ;;  %v2902_v5 = vld [vmem:[#allocation5 + $0x5b0] ss:$24 sps:$4 sm:$0xff]  }
  0xd5   :  { %2069 = vmatprep.subr.bf16.mxu1 %v2820_v6  ;;  %v2910_v6 = vld [vmem:[#allocation5 + $0x584] ss:$24 sps:$4 sm:$0xff]  }
  0xd6   :  { %2027 = vmatpush2.bf16.msra.mxu0 %v2815_v7  ;;  %v2905_v7 = vld [vmem:[#allocation5 + $0x280] ss:$24 sps:$4 sm:$0xff]  }
  0xd7   :  { %2028 = vmatprep.subr.bf16.mxu0 %v2823_v8  ;;  %v2913_v8 = vld [vmem:[#allocation5 + $0x254] ss:$24 sps:$4 sm:$0xff]  }
  0xd8   :  { %2070 = vmatpush2.bf16.msra.mxu1 %v2818_v9  ;;  %v2908_v9 = vld [vmem:[#allocation5 + $0x580] ss:$24 sps:$4 sm:$0xff]  }
  0xd9   :  { %2071 = vmatprep.subr.bf16.mxu1 %v2826_v10  ;;  %v2916_v10 = vld [vmem:[#allocation5 + $0x554] ss:$24 sps:$4 sm:$0xff]  }
  0xda   :  { %2029 = vmatpush2.bf16.msra.mxu0 %v2821_v12  ;;  %v2911_v12 = vld [vmem:[#allocation5 + $0x250] ss:$24 sps:$4 sm:$0xff]  }
  0xdb   :  { %2030 = vmatprep.subr.bf16.mxu0 %v2829_v13  ;;  %v2919_v13 = vld [vmem:[#allocation5 + $0x224] ss:$24 sps:$4 sm:$0xff]  }
  0xdc   :  { %2072 = vmatpush2.bf16.msra.mxu1 %v2824_v15  ;;  %v2914_v15 = vld [vmem:[#allocation5 + $0x550] ss:$24 sps:$4 sm:$0xff]  }
  0xdd   :  { %2073 = vmatprep.subr.bf16.mxu1 %v2832_v16  ;;  %v2922_v16 = vld [vmem:[#allocation5 + $0x524] ss:$24 sps:$4 sm:$0xff]  }
  0xde   :  { %2031 = vmatpush2.bf16.msra.mxu0 %v2827_v17  ;;  %v2917_v17 = vld [vmem:[#allocation5 + $0x220] ss:$24 sps:$4 sm:$0xff]  }
  0xdf   :  { %2032 = vmatprep.subr.bf16.mxu0 %v2835_v18  ;;  %v2925_v18 = vld [vmem:[#allocation5 + $0x1f4] ss:$24 sps:$4 sm:$0xff]  }
  0xe0   :  { %2074 = vmatpush2.bf16.msra.mxu1 %v2830_v19  ;;  %v2920_v19 = vld [vmem:[#allocation5 + $0x520] ss:$24 sps:$4 sm:$0xff]  }
  0xe1   :  { %2075 = vmatprep.subr.bf16.mxu1 %v2838_v20  ;;  %v2928_v20 = vld [vmem:[#allocation5 + $0x4f4] ss:$24 sps:$4 sm:$0xff]  }
  0xe2   :  { %2033 = vmatpush2.bf16.msra.mxu0 %v2833_v21  ;;  %v2923_v21 = vld [vmem:[#allocation5 + $0x1f0] ss:$24 sps:$4 sm:$0xff]  }
  0xe3   :  { %2034 = vmatprep.subr.bf16.mxu0 %v2841_v23  ;;  %v2931_v23 = vld [vmem:[#allocation5 + $0x1c4] ss:$24 sps:$4 sm:$0xff]  }
  0xe4   :  { %2076 = vmatpush2.bf16.msra.mxu1 %v2836_v24  ;;  %v2926_v24 = vld [vmem:[#allocation5 + $0x4f0] ss:$24 sps:$4 sm:$0xff]  }
  0xe5   :  { %2077 = vmatprep.subr.bf16.mxu1 %v2844_v25  ;;  %v2934_v25 = vld [vmem:[#allocation5 + $0x4c4] ss:$24 sps:$4 sm:$0xff]  }
  0xe6   :  { %2035 = vmatpush2.bf16.msra.mxu0 %v2839_v26  ;;  %v2929_v26 = vld [vmem:[#allocation5 + $0x1c0] ss:$24 sps:$4 sm:$0xff]  }
  0xe7   :  { %2090 = vmatprep.subr.bf16.mxu0 %v2847_v27  ;;  %v2937_v27 = vld [vmem:[#allocation5 + $0x194] ss:$24 sps:$4 sm:$0xff]  }
  0xe8   :  { %2078 = vmatpush2.bf16.msra.mxu1 %v2842_v28  ;;  %v2932_v28 = vld [vmem:[#allocation5 + $0x4c0] ss:$24 sps:$4 sm:$0xff]  }
  0xe9   :  { %2037 = vmatmul.mubr.bf16.vlgmr.msra.gmra.mxu0 %v3147_v14  ;;  %2133 = vmatprep.subr.bf16.mxu1 %v2850_v29  ;;  %v2940_v29 = vld [vmem:[#allocation5 + $0x494] ss:$24 sps:$4 sm:$0xff]  }
  0xea   :  { %2091 = vmatpush1.bf16.msra.mxu0 %v2845_v30  ;;  %2122 = vmatprep.mubr.bf16.mxu0 %v3139_v49  ;;  %v2863_v49 = vld [vmem:[#allocation5 + $0xd0] ss:$24 sps:$4 sm:$0xff]  }
  0xeb   :  { %2080 = vmatmul.mubr.bf16.vlgmr.msra.gmra.mxu1 %v3155_v22  ;;  %2092 = vmatprep.subr.bf16.mxu0 %v2853_v31  ;;  %v2935_v30 = vld [vmem:[#allocation5 + $0x190] ss:$24 sps:$4 sm:$0xff]   ;;  %v2943_v31 = vld [vmem:[#allocation5 + $0x764] ss:$24 sps:$4 sm:$0xff]  }
  0xec   :  { %2134 = vmatpush1.bf16.msra.mxu1 %v2848_v32  ;;  %2165 = vmatprep.mubr.bf16.mxu1 %v3142_v55  ;;  %v2869_v55 = vld [vmem:[#allocation5 + $0xa0] ss:$24 sps:$4 sm:$0xff]   ;;  %v2938_v32 = vld [vmem:[#allocation5 + $0x490] ss:$24 sps:$4 sm:$0xff]  }
  0xed   :  { %2135 = vmatprep.subr.bf16.mxu1 %v2856_v33  ;;  %v2941_v33 = vld [vmem:[#allocation5 + $0x760] ss:$24 sps:$4 sm:$0xff]  }
  0xee   :  { %2093 = vmatpush1.bf16.msra.mxu0 %v2851_v34  ;;  %v2946_v34 = vld [vmem:[#allocation5 + $0x734] ss:$24 sps:$4 sm:$0xff]  }
  0xef   :  { %2094 = vmatprep.subr.bf16.mxu0 %v2859_v35  ;;  %v2944_v35 = vld [vmem:[#allocation5 + $0x730] ss:$24 sps:$4 sm:$0xff]  }
  0xf0   :  { %2136 = vmatpush1.bf16.msra.mxu1 %v2854_v36  ;;  %v2949_v36 = vld [vmem:[#allocation5 + $0x704] ss:$24 sps:$4 sm:$0xff]  }
  0xf1   :  { %2137 = vmatprep.subr.bf16.mxu1 %v2862_v37  ;;  %v2947_v37 = vld [vmem:[#allocation5 + $0x700] ss:$24 sps:$4 sm:$0xff]  }
  0xf2   :  { %2095 = vmatpush1.bf16.msra.mxu0 %v2857_v38  ;;  %v2952_v38 = vld [vmem:[#allocation5 + $0x6d4] ss:$24 sps:$4 sm:$0xff]  }
  0xf3   :  { %2096 = vmatprep.subr.bf16.mxu0 %v2865_v39  ;;  %v2950_v39 = vld [vmem:[#allocation5 + $0x6d0] ss:$24 sps:$4 sm:$0xff]  }
  0xf4   :  { %2138 = vmatpush1.bf16.msra.mxu1 %v2860_v40  ;;  %v2955_v40 = vld [vmem:[#allocation5 + $0x6a4] ss:$24 sps:$4 sm:$0xff]  }
  0xf5   :  { %2139 = vmatprep.subr.bf16.mxu1 %v2868_v41  ;;  %v2953_v41 = vld [vmem:[#allocation5 + $0x6a0] ss:$24 sps:$4 sm:$0xff]  }
  0xf6   :  { %2097 = vmatpush1.bf16.msra.mxu0 %v2863_v49  ;;  %v2956_v49 = vld [vmem:[#allocation5 + $0x670] ss:$24 sps:$4 sm:$0xff]  }
  0xf7   :  { %2098 = vmatprep.subr.bf16.mxu0 %v2871_v42  ;;  %v2964_v42 = vld [vmem:[#allocation5 + $0x614] ss:$24 sps:$4 sm:$0xff]  }
  0xf8   :  { %2140 = vmatpush1.bf16.msra.mxu1 %v2866_v44  ;;  %v2962_v44 = vld [vmem:[#allocation5 + $0x610] ss:$24 sps:$4 sm:$0xff]  }
  0xf9   :  { %2141 = vmatprep.subr.bf16.mxu1 %v2874_v45  ;;  %v2967_v45 = vld [vmem:[#allocation5 + $0x8e4] ss:$24 sps:$4 sm:$0xff]  }
  0xfa   :  { %2099 = vmatpush1.bf16.msra.mxu0 %v2869_v55  ;;  %v2965_v55 = vld [vmem:[#allocation5 + $0x8e0] ss:$24 sps:$4 sm:$0xff]  }
  0xfb   :  { %2100 = vmatprep.subr.bf16.mxu0 %v2877_v46  ;;  %v2970_v46 = vld [vmem:[#allocation5 + $0x8b4] ss:$24 sps:$4 sm:$0xff]  }
  0xfc   :  { %2142 = vmatpush1.bf16.msra.mxu1 %v2872_v47  ;;  %v2968_v47 = vld [vmem:[#allocation5 + $0x8b0] ss:$24 sps:$4 sm:$0xff]  }
  0xfd   :  { %2143 = vmatprep.subr.bf16.mxu1 %v2880_v48  ;;  %v2973_v48 = vld [vmem:[#allocation5 + $0x884] ss:$24 sps:$4 sm:$0xff]  }
  0xfe   :  { %2101 = vmatpush1.bf16.msra.mxu0 %v2875_v50  ;;  %v2971_v50 = vld [vmem:[#allocation5 + $0x880] ss:$24 sps:$4 sm:$0xff]  }
  0xff   :  { %2102 = vmatprep.subr.bf16.mxu0 %v2883_v51  ;;  %v2976_v51 = vld [vmem:[#allocation5 + $0x854] ss:$24 sps:$4 sm:$0xff]  }
 0x100   :  { %2144 = vmatpush1.bf16.msra.mxu1 %v2878_v52  ;;  %v2974_v52 = vld [vmem:[#allocation5 + $0x850] ss:$24 sps:$4 sm:$0xff]  }
 0x101   :  { %2145 = vmatprep.subr.bf16.mxu1 %v2886_v53  ;;  %v2979_v53 = vld [vmem:[#allocation5 + $0x824] ss:$24 sps:$4 sm:$0xff]  }
 0x102   :  { %2103 = vmatpush1.bf16.msra.mxu0 %v2881_v54  ;;  %v362_v54 = vlaneseq }
 0x103   :  { %2104 = vmatprep.subr.bf16.mxu0 %v2889_v56  ;;  %v2977_v56 = vld [vmem:[#allocation5 + $0x820] ss:$24 sps:$4 sm:$0xff]  }
 0x104   :  { %2146 = vmatpush1.bf16.msra.mxu1 %v2884_v57  ;;  %v2982_v57 = vld [vmem:[#allocation5 + $0x7f4] ss:$24 sps:$4 sm:$0xff]  }
 0x105   :  { %2147 = vmatprep.subr.bf16.mxu1 %v2892_v58  ;;  %v3168_v58 = vshrl.u32 %v362_v54, 7 }
 0x106   :  { %2105 = vmatpush1.bf16.msra.mxu0 %v2887_v59  ;;  %v2980_v59 = vld [vmem:[#allocation5 + $0x7f0] ss:$24 sps:$4 sm:$0xff]  }
 0x107   :  { %2106 = vmatprep.subr.bf16.mxu0 %v2895_v60 }
 0x108   :  { %2148 = vmatpush1.bf16.msra.mxu1 %v2890_v61  ;;  %v2985_v61 = vld [vmem:[#allocation5 + $0x7c4] ss:$24 sps:$4 sm:$0xff]  }
 0x109   :  { %2149 = vmatprep.subr.bf16.mxu1 %v2898_v62  ;;  %v364_v62 = vsub.s32 0, %v3168_v58 }
 0x10a   :  { %2107 = vmatpush2.bf16.msra.mxu0 %v2893_v63  ;;  %v3171_v63 = vld [vmem:[#allocation7] sm:$0x3f] }
 0x10b   :  { %2108 = vmatprep.subr.bf16.mxu0 %v2901_v0  ;;  %v368_v0 = vsub.s32 1, %v3168_v58 }
 0x10c   :  { %2150 = vmatpush2.bf16.msra.mxu1 %v2896_v1  ;;  %v2983_v1 = vld [vmem:[#allocation5 + $0x7c0] ss:$24 sps:$4 sm:$0xff]  }
 0x10d   :  { %2151 = vmatprep.subr.bf16.mxu1 %v2904_v2 }
 0x10e   :  { %2109 = vmatpush2.bf16.msra.mxu0 %v2899_v3 }
 0x10f   :  { %2110 = vmatprep.subr.bf16.mxu0 %v2907_v4  ;;  %v2988_v4 = vld [vmem:[#allocation5 + $0x794] ss:$24 sps:$4 sm:$0xff]  }
 0x110   :  { %2152 = vmatpush2.bf16.msra.mxu1 %v2902_v5  ;;  %v365_v5 = vrot.slane %v3171_v63, %v364_v62 }
 0x111   :  { %2153 = vmatprep.subr.bf16.mxu1 %v2910_v6  ;;  %v369_v6 = vrot.slane %v3171_v63, %v368_v0 }
 0x112   :  { %2111 = vmatpush2.bf16.msra.mxu0 %v2905_v7  ;;  %v2986_v7 = vld [vmem:[#allocation5 + $0x790] ss:$24 sps:$4 sm:$0xff]  }
 0x113   :  { %2112 = vmatprep.subr.bf16.mxu0 %v2913_v8 }
 0x114   :  { %2154 = vmatpush2.bf16.msra.mxu1 %v2908_v9 }
 0x115   :  { %2155 = vmatprep.subr.bf16.mxu1 %v2916_v10 }
 0x116   :  { %2113 = vmatpush2.bf16.msra.mxu0 %v2911_v12 }
 0x117   :  { %2114 = vmatprep.subr.bf16.mxu0 %v2919_v13 }
 0x118   :  { %2156 = vmatpush2.bf16.msra.mxu1 %v2914_v15 }
 0x119   :  { %2157 = vmatprep.subr.bf16.mxu1 %v2922_v16 }
 0x11a   :  { %2115 = vmatpush2.bf16.msra.mxu0 %v2917_v17 }
 0x11b   :  { %2116 = vmatprep.subr.bf16.mxu0 %v2925_v18 }
 0x11c   :  { %2158 = vmatpush2.bf16.msra.mxu1 %v2920_v19 }
 0x11d   :  { %2159 = vmatprep.subr.bf16.mxu1 %v2928_v20 }
 0x11e   :  { %2117 = vmatpush2.bf16.msra.mxu0 %v2923_v21 }
 0x11f   :  { %2118 = vmatprep.subr.bf16.mxu0 %v2931_v23 }
 0x120   :  { %2160 = vmatpush2.bf16.msra.mxu1 %v2926_v24 }
 0x121   :  { %2161 = vmatprep.subr.bf16.mxu1 %v2934_v25 }
 0x122   :  { %2119 = vmatpush2.bf16.msra.mxu0 %v2929_v26 }
 0x123   :  { %2120 = vmatprep.subr.bf16.mxu0 %v2937_v27 }
 0x124   :  { %2162 = vmatpush2.bf16.msra.mxu1 %v2932_v28 }
 0x125   :  { %2163 = vmatprep.subr.bf16.mxu1 %v2940_v29 }
 0x126   :  { %2121 = vmatpush2.bf16.msra.mxu0 %v2935_v30 }
 0x127   :  { %2176 = vmatprep.subr.bf16.mxu0 %v2943_v31 }
 0x128   :  { %2164 = vmatpush2.bf16.msra.mxu1 %v2938_v32 }
 0x129   :  { %2123 = vmatmul.mubr.bf16.vlgmr.msra.gmra.mxu0 %v3145_v11  ;;  %v2958_v11 = vld [vmem:[#allocation5 + $0x674] ss:$24 sps:$4 sm:$0xff]   ;;  %v1866_v60 = vpop.f32.mrf.mxu0 }
 0x12a   :  { %2177 = vmatpush1.bf16.msra.mxu0 %v2941_v33  ;;  %2208 = vmatprep.mubr.bf16.mxu0 %v3152_v43  ;;  %v2961_v43 = vld [vmem:[#allocation5 + $0x644] ss:$24 sps:$4 sm:$0xff]   ;;  %v1909_v3 = vpop.f32.mrf.mxu1  ;;  %v1867_v10 = vadd.f32 %v1866_v60, %v365_v5 }
 0x12b   :  { %2166 = vmatmul.mubr.bf16.vlgmr.msra.gmra.mxu1 %v3147_v14  ;;  %2178 = vmatprep.subr.bf16.mxu0 %v2946_v34  ;;  %v2959_v14 = vld [vmem:[#allocation5 + $0x640] ss:$24 sps:$4 sm:$0xff]   ;;  %v1868_v2 = vpop.f32.mrf.mxu0 }
 0x12c   :  { %v1911_v9 = vpop.f32.mrf.mxu1  ;;  %v1869_v12 = vadd.f32 %v1868_v2, %v369_v6  ;;  %v1910_v16 = vadd.f32 %v1909_v3, %v1867_v10 }
 0x12d   :  { %v1870_v8 = vpop.f32.mrf.mxu0 }
 0x12e   :  { %2179 = vmatpush1.bf16.msra.mxu0 %v2944_v35  ;;  %v1913_v15 = vpop.f32.mrf.mxu1  ;;  %v1871_v17 = vadd.f32 %v1870_v8, %v365_v5  ;;  %v1912_v19 = vadd.f32 %v1911_v9, %v1869_v12  ;;  %v384_v5 = vsub.s32 5, %v3168_v58 }
 0x12f   :  { %2180 = vmatprep.subr.bf16.mxu0 %v2949_v36  ;;  %v1872_v13 = vpop.f32.mrf.mxu0  ;;  %v372_v36 = vsub.s32 2, %v3168_v58 }
 0x130   :  { %v1873_v20 = vadd.f32 %v1872_v13, %v369_v6  ;;  %v1915_v23 = vpop.f32.mrf.mxu1  ;;  %v1914_v25 = vadd.f32 %v1913_v15, %v1871_v17  ;;  %v385_v9 = vrot.slane %v3171_v63, %v384_v5 }
 0x132   :  { %2181 = vmatpush1.bf16.msra.mxu0 %v2947_v37  ;;  %v1916_v28 = vadd.f32 %v1915_v23, %v1873_v20 }
 0x133   :  { %2182 = vmatprep.subr.bf16.mxu0 %v2952_v38  ;;  %v376_v38 = vsub.s32 3, %v3168_v58 }
 0x136   :  { %2183 = vmatpush1.bf16.msra.mxu0 %v2950_v39  ;;  %v373_v39 = vrot.slane %v3171_v63, %v372_v36 }
 0x137   :  { %2184 = vmatprep.subr.bf16.mxu0 %v2955_v40 }
 0x13a   :  { %2185 = vmatpush1.bf16.msra.mxu0 %v2953_v41  ;;  %v377_v41 = vrot.slane %v3171_v63, %v376_v38 }
 0x13b   :  { %2186 = vmatprep.subr.bf16.mxu0 %v2958_v11 }
 0x13e   :  { %2187 = vmatpush1.bf16.msra.mxu0 %v2956_v49 }
 0x13f   :  { %2188 = vmatprep.subr.bf16.mxu0 %v2961_v43 }
 0x142   :  { %2189 = vmatpush1.bf16.msra.mxu0 %v2959_v14 }
 0x143   :  { %2190 = vmatprep.subr.bf16.mxu0 %v2964_v42 }
 0x146   :  { %2191 = vmatpush1.bf16.msra.mxu0 %v2962_v44 }
 0x147   :  { %2192 = vmatprep.subr.bf16.mxu0 %v2967_v45 }
 0x14a   :  { %2193 = vmatpush2.bf16.msra.mxu0 %v2965_v55 }
 0x14b   :  { %2194 = vmatprep.subr.bf16.mxu0 %v2970_v46 }
 0x14e   :  { %2195 = vmatpush2.bf16.msra.mxu0 %v2968_v47 }
 0x14f   :  { %2196 = vmatprep.subr.bf16.mxu0 %v2973_v48 }
 0x152   :  { %2197 = vmatpush2.bf16.msra.mxu0 %v2971_v50 }
 0x153   :  { %2198 = vmatprep.subr.bf16.mxu0 %v2976_v51 }
 0x156   :  { %2199 = vmatpush2.bf16.msra.mxu0 %v2974_v52 }
 0x157   :  { %2200 = vmatprep.subr.bf16.mxu0 %v2979_v53 }
 0x15a   :  { %2201 = vmatpush2.bf16.msra.mxu0 %v2977_v56 }
 0x15b   :  { %2202 = vmatprep.subr.bf16.mxu0 %v2982_v57 }
 0x15e   :  { %2203 = vmatpush2.bf16.msra.mxu0 %v2980_v59 }
 0x15f   :  { %2204 = vmatprep.subr.bf16.mxu0 %v2985_v61 }
 0x162   :  { %2205 = vmatpush2.bf16.msra.mxu0 %v2983_v1 }
 0x163   :  { %2206 = vmatprep.subr.bf16.mxu0 %v2988_v4  ;;  %v380_v4 = vsub.s32 4, %v3168_v58 }
 0x165   :  { %v381_v8 = vrot.slane %v3171_v63, %v380_v4 }
 0x166   :  { %2207 = vmatpush2.bf16.msra.mxu0 %v2986_v7 }
 0x169   :  { %v1952_v18 = vpop.f32.mrf.mxu0  ;;  %2209 = vmatmul.mubr.bf16.vlgmr.msra.gmra.mxu0 %v3155_v22 }
 0x16a   :  { %v1953_v21 = vadd.f32 %v1952_v18, %v1910_v16 }
 0x16b   :  { %v1954_v24 = vpop.f32.mrf.mxu0  ;;  %v1995_v35 = vpop.f32.mrf.mxu1 }
 0x16c   :  { %2989 = vtanh.f32 %v1953_v21  ;;  %v1955_v26 = vadd.f32 %v1954_v24, %v1912_v19  ;;  %v1996_v11 = vadd.f32 %v1995_v35, %v373_v39 }
 0x16d   :  { %v1956_v27 = vpop.f32.mrf.mxu0  ;;  %v1997_v37 = vpop.f32.mrf.mxu1 }
 0x16e   :  { %2991 = vtanh.f32 %v1955_v26  ;;  %v1957_v29 = vadd.f32 %v1956_v27, %v1914_v25  ;;  %v1998_v43 = vadd.f32 %v1997_v37, %v377_v41 }
 0x16f   :  { %v1958_v30 = vpop.f32.mrf.mxu0  ;;  %v1999_v40 = vpop.f32.mrf.mxu1 }
 0x170   :  { %2993 = vtanh.f32 %v1957_v29  ;;  %v1959_v31 = vadd.f32 %v1958_v30, %v1916_v28  ;;  %v2000_v55 = vadd.f32 %v1999_v40, %v373_v39 }
 0x171   :  { %v2001_v49 = vpop.f32.mrf.mxu1 }
 0x172   :  { %2995 = vtanh.f32 %v1959_v31  ;;  %v2002_v51 = vadd.f32 %v2001_v49, %v377_v41 }
 0x179   :  { %v2990_v32 = vpop.eup %2989 }
 0x17a   :  { %2231 = vst [vmem:[#allocation8] sm:$0xff] %v2990_v32 }
 0x17b   :  { %v2992_v33 = vpop.eup %2991 }
 0x17c   :  { %2232 = vst [vmem:[#allocation8 + $0x8] sm:$0xff] %v2992_v33 }
 0x17d   :  { %v2994_v22 = vpop.eup %2993 }
 0x17e   :  { %2237 = vst [vmem:[#allocation8 + $0x30] sm:$0xff] %v2994_v22 }
 0x17f   :  { %v2996_v34 = vpop.eup %2995 }
 0x180   :  { %2238 = vst [vmem:[#allocation8 + $0x38] sm:$0xff] %v2996_v34 }
 0x1a9   :  { %v2038_v14 = vpop.f32.mrf.mxu0 }
 0x1aa   :  { %v2039_v42 = vadd.f32 %v2038_v14, %v1996_v11 }
 0x1ab   :  { %v2040_v44 = vpop.f32.mrf.mxu0  ;;  %v2081_v45 = vpop.f32.mrf.mxu1 }
 0x1ac   :  { %v2041_v46 = vadd.f32 %v2040_v44, %v1998_v43  ;;  %v2082_v47 = vadd.f32 %v2081_v45, %v2039_v42 }
 0x1ad   :  { %v2042_v48 = vpop.f32.mrf.mxu0  ;;  %v2083_v50 = vpop.f32.mrf.mxu1 }
 0x1ae   :  { %2997 = vtanh.f32 %v2082_v47  ;;  %v2043_v52 = vadd.f32 %v2042_v48, %v2000_v55  ;;  %v2084_v53 = vadd.f32 %v2083_v50, %v2041_v46 }
 0x1af   :  { %v2044_v54 = vpop.f32.mrf.mxu0  ;;  %v2085_v56 = vpop.f32.mrf.mxu1 }
 0x1b0   :  { %2999 = vtanh.f32 %v2084_v53  ;;  %v2045_v57 = vadd.f32 %v2044_v54, %v2002_v51  ;;  %v2086_v59 = vadd.f32 %v2085_v56, %v2043_v52 }
 0x1b1   :  { %v2087_v60 = vpop.f32.mrf.mxu1 }
 0x1b2   :  { %3001 = vtanh.f32 %v2086_v59  ;;  %v2088_v61 = vadd.f32 %v2087_v60, %v2045_v57 }
 0x1b4   :  { %3003 = vtanh.f32 %v2088_v61 }
 0x1bb   :  { %v2998_v62 = vpop.eup %2997 }
 0x1bc   :  { %2233 = vst [vmem:[#allocation8 + $0x10] sm:$0xff] %v2998_v62 }
 0x1bd   :  { %v3000_v0 = vpop.eup %2999 }
 0x1be   :  { %2234 = vst [vmem:[#allocation8 + $0x18] sm:$0xff] %v3000_v0 }
 0x1bf   :  { %v3002_v1 = vpop.eup %3001 }
 0x1c0   :  { %2239 = vst [vmem:[#allocation8 + $0x40] sm:$0xff] %v3002_v1 }
 0x1c1   :  { %v3004_v2 = vpop.eup %3003 }
 0x1c2   :  { %2240 = vst [vmem:[#allocation8 + $0x48] sm:$0xff] %v3004_v2 }
 0x1e9   :  { %v2124_v3 = vpop.f32.mrf.mxu0 }
 0x1ea   :  { %v2125_v13 = vadd.f32 %v2124_v3, %v381_v8 }
 0x1eb   :  { %v2126_v6 = vpop.f32.mrf.mxu0  ;;  %v2167_v7 = vpop.f32.mrf.mxu1 }
 0x1ec   :  { %v2127_v15 = vadd.f32 %v2126_v6, %v385_v9  ;;  %v2168_v18 = vadd.f32 %v2167_v7, %v2125_v13 }
 0x1ed   :  { %v2128_v10 = vpop.f32.mrf.mxu0  ;;  %v2169_v12 = vpop.f32.mrf.mxu1 }
 0x1ee   :  { %v2129_v19 = vadd.f32 %v2128_v10, %v381_v8  ;;  %v2170_v21 = vadd.f32 %v2169_v12, %v2127_v15 }
 0x1ef   :  { %v2130_v16 = vpop.f32.mrf.mxu0  ;;  %v2171_v17 = vpop.f32.mrf.mxu1 }
 0x1f0   :  { %v2131_v23 = vadd.f32 %v2130_v16, %v385_v9  ;;  %v2172_v26 = vadd.f32 %v2171_v17, %v2129_v19 }
 0x1f1   :  { %v2173_v25 = vpop.f32.mrf.mxu1 }
 0x1f2   :  { %v2174_v29 = vadd.f32 %v2173_v25, %v2131_v23 }
 0x229   :  { %v2210_v20 = vpop.f32.mrf.mxu0 }
 0x22a   :  { %v2211_v24 = vadd.f32 %v2210_v20, %v2168_v18 }
 0x22b   :  { %v2212_v58 = vpop.f32.mrf.mxu0 }
 0x22c   :  { %3005 = vtanh.f32 %v2211_v24  ;;  %v2213_v27 = vadd.f32 %v2212_v58, %v2170_v21 }
 0x22d   :  { %v2214_v28 = vpop.f32.mrf.mxu0 }
 0x22e   :  { %3007 = vtanh.f32 %v2213_v27  ;;  %v2215_v63 = vadd.f32 %v2214_v28, %v2172_v26 }
 0x22f   :  { %v2216_v30 = vpop.f32.mrf.mxu0 }
 0x230   :  { %3009 = vtanh.f32 %v2215_v63  ;;  %v2217_v31 = vadd.f32 %v2216_v30, %v2174_v29 }
 0x232   :  { %3011 = vtanh.f32 %v2217_v31 }
 0x239   :  { %v3006_v32 = vpop.eup %3005 }
 0x23a   :  { %2235 = vst [vmem:[#allocation8 + $0x20] sm:$0xff] %v3006_v32 }
 0x23b   :  { %v3008_v33 = vpop.eup %3007 }
 0x23c   :  { %2236 = vst [vmem:[#allocation8 + $0x28] sm:$0xff] %v3008_v33 }
 0x23d   :  { %v3010_v22 = vpop.eup %3009 }
 0x23e   :  { %2241 = vst [vmem:[#allocation8 + $0x50] sm:$0xff] %v3010_v22 }
 0x23f   :  { %v3012_v34 = vpop.eup %3011 }
 0x240   :  { %2242 = vst [vmem:[#allocation8 + $0x58] sm:$0xff] %v3012_v34 }
 0x241   :  { %3084 = shalt.err (!%p3081_p5)
}
 0x242   :  { %2254 = dma.vmem_to_hbm [thread:$0]  %s2249_s2, 1536, %s3194_s3, [#allocation4], %s3103_s22, %s3103_s22, %s3104_s23  }
 0x243   :  { %3097 = dma.done.wait [#allocation4], 1536  }
 0x244   :  { %3098 = vsyncadd [#allocation4], 4294965760 }
 0x245   :  { %2258 = vsyncpa [#allocation3], 1 }
 0x246   :  { %2259 = vsyncpa [#allocation6], 1 }
 0x247   :  { %2260 = vsyncpa [#allocation4], 1 }

</bundles_post_ra>
